<compile_context>
chip_gen: v5e
topology: v5e:2x2
jax: 0.10.0
libtpu: 0.0.40
codegen_flags: <defaults>
</compile_context>

<pallas_src>
import functools

import jax
import jax.numpy as jnp
from jax.experimental import pallas as pl
from jax.experimental.pallas import tpu as pltpu


# -----------------------------------------------------------------------------
# Fused BiLSTM-stack kernel (+ mean-pool & folded BatchNorm/FC head)
# -----------------------------------------------------------------------------
def _bilstm_stack_kernel(S, B, H, num_layers, *refs):
    """All sequence tensors are time-major, flattened to 2-D (row = t*B + b).

    Fused gate-column layout (8H): [i_f i_b | f_f f_b | o_f o_b | g_f g_b].
    Fused state layout (2H): [fwd | bwd]; at loop step t the state holds the
    forward direction at time t and the backward direction at time S-1-t.
    """
    HH = 2 * H

    idx = 0
    x_ref = refs[idx]; idx += 1
    layers = []
    for _ in range(num_layers):
        layers.append(refs[idx:idx + 4])          # (w_A, w_B, bias, w_hh)
        idx += 4
    w_eff_ref, b_eff_ref = refs[idx], refs[idx + 1]; idx += 2
    out_ref = refs[idx]; idx += 1
    xg_ref = refs[idx]; idx += 1                  # (S*B, 8H) hoisted gate inputs
    hstep_refs = refs[idx:]                       # (S*B, 2H) inter-layer hiddens

    def build_xg(x, w_a_ref, w_b_ref, b_ref):
        # Hoisted input projection: one big MXU matmul per direction, bias folded in.
        # Row block t of xg gets the fwd-gate inputs from time t (natural order) and
        # the bwd-gate inputs from time S-1-t (added via tile-aligned block adds,
        # all outside the serial recurrence).
        xg_ref[...] = b_ref[...] + jnp.dot(x, w_a_ref[...],
                                           preferred_element_type=jnp.float32)
        rev = jnp.dot(x, w_b_ref[...], preferred_element_type=jnp.float32)
        for t in range(S):                        # static trip count
            r = (S - 1 - t) * B
            xg_ref[t * B:(t + 1) * B, :] = (xg_ref[t * B:(t + 1) * B, :]
                                            + rev[r:r + B, :])

    def recurrence(w_hh_ref, store_ref, pooled):
        w_hh = w_hh_ref[...]

        def step(t, carry):
            h, c, acc = carry                     # state lives in vregs (loop carry)
            row = pl.multiple_of(t * B, B)
            gates = xg_ref[pl.ds(row, B), :] + jnp.dot(
                h.astype(w_hh.dtype), w_hh, preferred_element_type=jnp.float32)
            sig = jax.nn.sigmoid(gates[:, 0:6 * H])   # one wide sigmoid: [i | f | o]
            i = sig[:, 0:2 * H]
            f = sig[:, 2 * H:4 * H]
            o = sig[:, 4 * H:6 * H]
            g = jnp.tanh(gates[:, 6 * H:8 * H])       # one tanh: [g_f | g_b]
            c = f * c + i * g
            h = o * jnp.tanh(c)
            if pooled:
                acc = acc + h                         # time-sum in vregs
            else:
                store_ref[pl.ds(row, B), :] = h       # single full-width store/step
            return h, c, acc

        z = jnp.zeros((B, HH), jnp.float32)
        _, _, acc = jax.lax.fori_loop(0, S, step, (z, z, z), unroll=min(S, 8))
        return acc

    x = x_ref[...]
    for l in range(num_layers):
        w_a_ref, w_b_ref, b_ref, w_hh_ref = layers[l]
        build_xg(x, w_a_ref, w_b_ref, b_ref)
        if l == num_layers - 1:
            acc = recurrence(w_hh_ref, None, pooled=True)
            # mean-pool over time + (BatchNorm-eval + FC) folded into w_eff / b_eff.
            out_ref[...] = (jnp.dot(acc, w_eff_ref[...],
                                    preferred_element_type=jnp.float32) * (1.0 / S)
                            + b_eff_ref[...])
        else:
            store_ref = hstep_refs[l % len(hstep_refs)]
            recurrence(w_hh_ref, store_ref, pooled=False)
            x = store_ref[...].astype(x.dtype)


# -----------------------------------------------------------------------------
# Weight preprocessing (runs once in XLA, outside the kernel)
# -----------------------------------------------------------------------------
def _reorder_gates(w):
    """Gate columns: PyTorch order [i, f, g, o] -> kernel order [i, f, o, g]."""
    i, f, g, o = jnp.split(w, 4, axis=-1)
    return jnp.concatenate([i, f, o, g], axis=-1)


def _spread_gates(w_ifog, H, offset):
    """(D, 4H) per-direction gates -> (D, 8H) fused columns.

    Fused layout [i_f i_b | f_f f_b | o_f o_b | g_f g_b]; offset 0 = forward
    (even H-blocks), offset 1 = backward (odd H-blocks). Zeros elsewhere.
    """
    D = w_ifog.shape[0]
    out = jnp.zeros((D, 8 * H), w_ifog.dtype)
    for k in range(4):
        out = out.at[:, (2 * k + offset) * H:(2 * k + offset + 1) * H].set(
            w_ifog[:, k * H:(k + 1) * H])
    return out


def _prepare_layer(layer, H, first):
    wf = _spread_gates(_reorder_gates(layer["w_ih_f"]), H, 0)
    wb = _spread_gates(_reorder_gates(layer["w_ih_b"]), H, 1)
    if first:
        w_a, w_b = wf, wb
    else:
        # The previous layer's hiddens are stored in "step order"
        # ([h_f(t) | h_b(S-1-t)] at row block t); fold the un-scrambling into the
        # hoisted projection by mixing the fwd/bwd input-weight row halves.
        w_a = jnp.concatenate([wf[:H], wb[H:]], axis=0)
        w_b = jnp.concatenate([wb[:H], wf[H:]], axis=0)
    bias = (_spread_gates(_reorder_gates(layer["b_f"][None, :]), H, 0)
            + _spread_gates(_reorder_gates(layer["b_b"][None, :]), H, 1))
    w_hh = jnp.concatenate([_spread_gates(_reorder_gates(layer["w_hh_f"]), H, 0),
                            _spread_gates(_reorder_gates(layer["w_hh_b"]), H, 1)],
                           axis=0)
    return w_a, w_b, bias, w_hh


# -----------------------------------------------------------------------------
# Full forward pass
# -----------------------------------------------------------------------------
def glove_classifier_forward(x_ids, params, compute_dtype=jnp.bfloat16):
    B, S = x_ids.shape
    assert B % 8 == 0, "batch must be a multiple of 8 (sublane-aligned row blocks)"
    H = params["lstm"][0]["w_hh_f"].shape[0]      # per-direction hidden size
    L = len(params["lstm"])

    # Embedding gather directly into time-major flattened (S*B, E) layout
    # (row = t*B + b). Dropout == identity at inference.
    x = jnp.take(params["embedding"], x_ids.T.reshape(-1), axis=0).astype(compute_dtype)

    args = [x]
    for l, layer in enumerate(params["lstm"]):
        w_a, w_b, bias, w_hh = _prepare_layer(layer, H, first=(l == 0))
        args += [w_a.astype(compute_dtype), w_b.astype(compute_dtype),
                 bias.astype(jnp.float32), w_hh.astype(compute_dtype)]

    # Fold BatchNorm1d (eval / running stats) + mean-pool + fc1 into one affine head.
    eps = 1e-5
    scale = params["bn_gamma"] / jnp.sqrt(params["bn_var"] + eps)
    shift = params["bn_beta"] - params["bn_mean"] * scale
    w_eff = (scale[:, None] * params["w_fc_t"]).astype(jnp.float32)        # (2H, O)
    b_eff = (shift @ params["w_fc_t"] + params["b_fc"]).reshape(1, -1)     # (1, O)
    O = w_eff.shape[1]
    args += [w_eff, b_eff.astype(jnp.float32)]

    n_hstep = 0 if L == 1 else (1 if L == 2 else 2)
    scratch = [pltpu.VMEM((S * B, 8 * H), jnp.float32)]
    scratch += [pltpu.VMEM((S * B, 2 * H), jnp.float32)] * n_hstep

    # vmem_limit from the actual resident footprint (inputs + output + scratch),
    # with 2x headroom for compiler temporaries.
    resident = sum(int(a.size) * a.dtype.itemsize for a in args)
    resident += 4 * (S * B * 8 * H + n_hstep * S * B * 2 * H + B * O)
    vmem_limit = int(min(max(2 * resident, 4 << 20), 100 << 20))

    kernel = functools.partial(_bilstm_stack_kernel, S, B, H, L)
    return pl.pallas_call(
        kernel,
        out_shape=jax.ShapeDtypeStruct((B, O), jnp.float32),
        scratch_shapes=scratch,
        compiler_params=pltpu.CompilerParams(vmem_limit_bytes=vmem_limit),
    )(*args)


# -----------------------------------------------------------------------------
# Pure-JAX reference (for in-script correctness check)
# -----------------------------------------------------------------------------
def _lstm_dir_ref(x_tm, w_ih_t, w_hh_t, b):
    B = x_tm.shape[1]
    H = w_hh_t.shape[0]

    def step(carry, x_t):
        hh, cc = carry
        gates = x_t @ w_ih_t + hh @ w_hh_t + b
        i = jax.nn.sigmoid(gates[:, 0:H])
        f = jax.nn.sigmoid(gates[:, H:2 * H])
        g = jnp.tanh(gates[:, 2 * H:3 * H])
        o = jax.nn.sigmoid(gates[:, 3 * H:4 * H])
        cc = f * cc + i * g
        hh = o * jnp.tanh(cc)
        return (hh, cc), hh

    init = (jnp.zeros((B, H), jnp.float32), jnp.zeros((B, H), jnp.float32))
    _, ys = jax.lax.scan(step, init, x_tm)
    return ys


def glove_classifier_ref(x_ids, params):
    emb = jnp.take(params["embedding"], x_ids, axis=0)
    h = jnp.transpose(emb, (1, 0, 2)).astype(jnp.float32)
    for layer in params["lstm"]:
        fwd = _lstm_dir_ref(h, layer["w_ih_f"], layer["w_hh_f"], layer["b_f"])
        bwd = _lstm_dir_ref(h[::-1], layer["w_ih_b"], layer["w_hh_b"], layer["b_b"])[::-1]
        h = jnp.concatenate([fwd, bwd], axis=-1)
    eps = 1e-5
    scale = params["bn_gamma"] / jnp.sqrt(params["bn_var"] + eps)
    shift = params["bn_beta"] - params["bn_mean"] * scale
    y = h * scale[None, None, :] + shift[None, None, :]
    pooled = jnp.mean(y, axis=0)
    return pooled @ params["w_fc_t"] + params["b_fc"][None, :]


# -----------------------------------------------------------------------------
# Deterministic parameter construction (PyTorch gate order [i, f, g, o])
# -----------------------------------------------------------------------------
def make_params(key, vocab, emb_dim, hidden_dim, output_dim, num_layers=2):
    H = hidden_dim // 2  # per-direction hidden size (bidirectional)
    keys = iter(jax.random.split(key, 64))
    params = {}
    params["embedding"] = jax.random.uniform(
        next(keys), (vocab, emb_dim), jnp.float32, -0.05, 0.05)
    lstm_layers = []
    in_dim = emb_dim
    for _ in range(num_layers):
        layer = {}
        for d in ("f", "b"):
            layer[f"w_ih_{d}"] = 0.1 * jax.random.normal(next(keys), (in_dim, 4 * H), jnp.float32)
            layer[f"w_hh_{d}"] = 0.1 * jax.random.normal(next(keys), (H, 4 * H), jnp.float32)
            layer[f"b_{d}"] = 0.05 * jax.random.normal(next(keys), (4 * H,), jnp.float32)
        lstm_layers.append(layer)
        in_dim = hidden_dim
    params["lstm"] = lstm_layers
    params["bn_gamma"] = 1.0 + 0.1 * jax.random.normal(next(keys), (hidden_dim,), jnp.float32)
    params["bn_beta"] = 0.1 * jax.random.normal(next(keys), (hidden_dim,), jnp.float32)
    params["bn_mean"] = 0.1 * jax.random.normal(next(keys), (hidden_dim,), jnp.float32)
    params["bn_var"] = 1.0 + 0.1 * jax.random.uniform(next(keys), (hidden_dim,), jnp.float32)
    params["w_fc_t"] = 0.1 * jax.random.normal(next(keys), (hidden_dim, output_dim), jnp.float32)
    params["b_fc"] = 0.05 * jax.random.normal(next(keys), (output_dim,), jnp.float32)
    return params


if __name__ == "__main__":
    # B chosen as a multiple of 8 (sublane-aligned); sizes kept small for the demo.
    VOCAB, B, S, E, HIDDEN, OUT = 50, 8, 8, 32, 32, 4

    key = jax.random.PRNGKey(0)
    k_param, k_ids = jax.random.split(key)
    params = make_params(k_param, VOCAB, E, HIDDEN, OUT)
    x_ids = jax.random.randint(k_ids, (B, S), 0, VOCAB, dtype=jnp.int32)

    ref = jax.block_until_ready(glove_classifier_ref(x_ids, params))

    # f32 path: strict structural/numerical check of the fused kernel.
    out_f32 = jax.block_until_ready(
        jax.jit(functools.partial(glove_classifier_forward,
                                  compute_dtype=jnp.float32))(x_ids, params))
    assert out_f32.shape == (B, OUT), out_f32.shape
    assert jnp.allclose(out_f32, ref, atol=1e-4, rtol=1e-4), (out_f32, ref)

    # bf16-MXU path (default): looser tolerance for bf16 matmul operands.
    out = jax.block_until_ready(jax.jit(glove_classifier_forward)(x_ids, params))
    assert out.shape == (B, OUT), out.shape
    assert jnp.allclose(out, ref, atol=2e-2, rtol=2e-2), (out, ref)

    print("KERNEL_OK")
</pallas_src>

<mosaic_0001>
module attributes {stable_mosaic.version = 11 : i64} {
  func.func @_bilstm_stack_kernel(%arg0: memref<64x32xf32, #tpu.memory_space<vmem>>, %arg1: memref<32x128xf32, #tpu.memory_space<vmem>>, %arg2: memref<32x128xf32, #tpu.memory_space<vmem>>, %arg3: memref<1x128xf32, #tpu.memory_space<vmem>>, %arg4: memref<32x128xf32, #tpu.memory_space<vmem>>, %arg5: memref<32x128xf32, #tpu.memory_space<vmem>>, %arg6: memref<32x128xf32, #tpu.memory_space<vmem>>, %arg7: memref<1x128xf32, #tpu.memory_space<vmem>>, %arg8: memref<32x128xf32, #tpu.memory_space<vmem>>, %arg9: memref<32x4xf32, #tpu.memory_space<vmem>>, %arg10: memref<1x4xf32, #tpu.memory_space<vmem>>, %arg11: memref<8x4xf32, #tpu.memory_space<vmem>>, %arg12: memref<64x128xf32, #tpu.memory_space<vmem>>, %arg13: memref<64x32xf32, #tpu.memory_space<vmem>>) attributes {dimension_semantics = [], scalar_prefetch = 0 : i64, scratch_operands = 2 : i64, tpu.core_type = #tpu.core_type<tc>} {
    %c0 = arith.constant 0 : index
    %c0_0 = arith.constant 0 : index
    %0 = vector.load %arg0[%c0, %c0_0] : memref<64x32xf32, #tpu.memory_space<vmem>>, vector<64x32xf32>
    %c0_1 = arith.constant 0 : index
    %c0_2 = arith.constant 0 : index
    %1 = vector.load %arg3[%c0_1, %c0_2] : memref<1x128xf32, #tpu.memory_space<vmem>>, vector<1x128xf32>
    %c0_3 = arith.constant 0 : index
    %c0_4 = arith.constant 0 : index
    %2 = vector.load %arg1[%c0_3, %c0_4] : memref<32x128xf32, #tpu.memory_space<vmem>>, vector<32x128xf32>
    %cst = arith.constant dense<0.000000e+00> : vector<64x128xf32>
    %3 = tpu.matmul %0, %2, %cst {dimension_numbers = #tpu.dot_dimension_numbers<[1], [0], [0], [1], [0, 0, 1, 1], [], []>} : vector<64x32xf32>, vector<32x128xf32>, vector<64x128xf32> -> vector<64x128xf32>
    %4 = vector.broadcast %1 : vector<1x128xf32> to vector<64x128xf32>
    %5 = arith.addf %4, %3 : vector<64x128xf32>
    %c0_5 = arith.constant 0 : index
    %c0_6 = arith.constant 0 : index
    %6 = vector.load %arg12[%c0_5, %c0_6] : memref<64x128xf32, #tpu.memory_space<vmem>>, vector<64x128xf32>
    tpu.vector_store %arg12[%c0_5, %c0_6], %5 {strides = array<i32>} : memref<64x128xf32, #tpu.memory_space<vmem>>, vector<64x128xf32>,
    %c0_7 = arith.constant 0 : index
    %c0_8 = arith.constant 0 : index
    %7 = vector.load %arg2[%c0_7, %c0_8] : memref<32x128xf32, #tpu.memory_space<vmem>>, vector<32x128xf32>
    %cst_9 = arith.constant dense<0.000000e+00> : vector<64x128xf32>
    %8 = tpu.matmul %0, %7, %cst_9 {dimension_numbers = #tpu.dot_dimension_numbers<[1], [0], [0], [1], [0, 0, 1, 1], [], []>} : vector<64x32xf32>, vector<32x128xf32>, vector<64x128xf32> -> vector<64x128xf32>
    %c0_10 = arith.constant 0 : index
    %c0_11 = arith.constant 0 : index
    %9 = vector.load %arg12[%c0_10, %c0_11] : memref<64x128xf32, #tpu.memory_space<vmem>>, vector<8x128xf32>
    %10 = vector.extract_strided_slice %8 {offsets = [56, 0], sizes = [8, 128], strides = [1, 1]} : vector<64x128xf32> to vector<8x128xf32>
    %11 = arith.addf %9, %10 : vector<8x128xf32>
    %c0_12 = arith.constant 0 : index
    %c0_13 = arith.constant 0 : index
    %12 = vector.load %arg12[%c0_12, %c0_13] : memref<64x128xf32, #tpu.memory_space<vmem>>, vector<8x128xf32>
    tpu.vector_store %arg12[%c0_12, %c0_13], %11 {strides = array<i32>} : memref<64x128xf32, #tpu.memory_space<vmem>>, vector<8x128xf32>,
    %c8 = arith.constant 8 : index
    %c0_14 = arith.constant 0 : index
    %13 = vector.load %arg12[%c8, %c0_14] : memref<64x128xf32, #tpu.memory_space<vmem>>, vector<8x128xf32>
    %14 = vector.extract_strided_slice %8 {offsets = [48, 0], sizes = [8, 128], strides = [1, 1]} : vector<64x128xf32> to vector<8x128xf32>
    %15 = arith.addf %13, %14 : vector<8x128xf32>
    %c8_15 = arith.constant 8 : index
    %c0_16 = arith.constant 0 : index
    %16 = vector.load %arg12[%c8_15, %c0_16] : memref<64x128xf32, #tpu.memory_space<vmem>>, vector<8x128xf32>
    tpu.vector_store %arg12[%c8_15, %c0_16], %15 {strides = array<i32>} : memref<64x128xf32, #tpu.memory_space<vmem>>, vector<8x128xf32>,
    %c16 = arith.constant 16 : index
    %c0_17 = arith.constant 0 : index
    %17 = vector.load %arg12[%c16, %c0_17] : memref<64x128xf32, #tpu.memory_space<vmem>>, vector<8x128xf32>
    %18 = vector.extract_strided_slice %8 {offsets = [40, 0], sizes = [8, 128], strides = [1, 1]} : vector<64x128xf32> to vector<8x128xf32>
    %19 = arith.addf %17, %18 : vector<8x128xf32>
    %c16_18 = arith.constant 16 : index
    %c0_19 = arith.constant 0 : index
    %20 = vector.load %arg12[%c16_18, %c0_19] : memref<64x128xf32, #tpu.memory_space<vmem>>, vector<8x128xf32>
    tpu.vector_store %arg12[%c16_18, %c0_19], %19 {strides = array<i32>} : memref<64x128xf32, #tpu.memory_space<vmem>>, vector<8x128xf32>,
    %c24 = arith.constant 24 : index
    %c0_20 = arith.constant 0 : index
    %21 = vector.load %arg12[%c24, %c0_20] : memref<64x128xf32, #tpu.memory_space<vmem>>, vector<8x128xf32>
    %22 = vector.extract_strided_slice %8 {offsets = [32, 0], sizes = [8, 128], strides = [1, 1]} : vector<64x128xf32> to vector<8x128xf32>
    %23 = arith.addf %21, %22 : vector<8x128xf32>
    %c24_21 = arith.constant 24 : index
    %c0_22 = arith.constant 0 : index
    %24 = vector.load %arg12[%c24_21, %c0_22] : memref<64x128xf32, #tpu.memory_space<vmem>>, vector<8x128xf32>
    tpu.vector_store %arg12[%c24_21, %c0_22], %23 {strides = array<i32>} : memref<64x128xf32, #tpu.memory_space<vmem>>, vector<8x128xf32>,
    %c32 = arith.constant 32 : index
    %c0_23 = arith.constant 0 : index
    %25 = vector.load %arg12[%c32, %c0_23] : memref<64x128xf32, #tpu.memory_space<vmem>>, vector<8x128xf32>
    %26 = vector.extract_strided_slice %8 {offsets = [24, 0], sizes = [8, 128], strides = [1, 1]} : vector<64x128xf32> to vector<8x128xf32>
    %27 = arith.addf %25, %26 : vector<8x128xf32>
    %c32_24 = arith.constant 32 : index
    %c0_25 = arith.constant 0 : index
    %28 = vector.load %arg12[%c32_24, %c0_25] : memref<64x128xf32, #tpu.memory_space<vmem>>, vector<8x128xf32>
    tpu.vector_store %arg12[%c32_24, %c0_25], %27 {strides = array<i32>} : memref<64x128xf32, #tpu.memory_space<vmem>>, vector<8x128xf32>,
    %c40 = arith.constant 40 : index
    %c0_26 = arith.constant 0 : index
    %29 = vector.load %arg12[%c40, %c0_26] : memref<64x128xf32, #tpu.memory_space<vmem>>, vector<8x128xf32>
    %30 = vector.extract_strided_slice %8 {offsets = [16, 0], sizes = [8, 128], strides = [1, 1]} : vector<64x128xf32> to vector<8x128xf32>
    %31 = arith.addf %29, %30 : vector<8x128xf32>
    %c40_27 = arith.constant 40 : index
    %c0_28 = arith.constant 0 : index
    %32 = vector.load %arg12[%c40_27, %c0_28] : memref<64x128xf32, #tpu.memory_space<vmem>>, vector<8x128xf32>
    tpu.vector_store %arg12[%c40_27, %c0_28], %31 {strides = array<i32>} : memref<64x128xf32, #tpu.memory_space<vmem>>, vector<8x128xf32>,
    %c48 = arith.constant 48 : index
    %c0_29 = arith.constant 0 : index
    %33 = vector.load %arg12[%c48, %c0_29] : memref<64x128xf32, #tpu.memory_space<vmem>>, vector<8x128xf32>
    %34 = vector.extract_strided_slice %8 {offsets = [8, 0], sizes = [8, 128], strides = [1, 1]} : vector<64x128xf32> to vector<8x128xf32>
    %35 = arith.addf %33, %34 : vector<8x128xf32>
    %c48_30 = arith.constant 48 : index
    %c0_31 = arith.constant 0 : index
    %36 = vector.load %arg12[%c48_30, %c0_31] : memref<64x128xf32, #tpu.memory_space<vmem>>, vector<8x128xf32>
    tpu.vector_store %arg12[%c48_30, %c0_31], %35 {strides = array<i32>} : memref<64x128xf32, #tpu.memory_space<vmem>>, vector<8x128xf32>,
    %c56 = arith.constant 56 : index
    %c0_32 = arith.constant 0 : index
    %37 = vector.load %arg12[%c56, %c0_32] : memref<64x128xf32, #tpu.memory_space<vmem>>, vector<8x128xf32>
    %38 = vector.extract_strided_slice %8 {offsets = [0, 0], sizes = [8, 128], strides = [1, 1]} : vector<64x128xf32> to vector<8x128xf32>
    %39 = arith.addf %37, %38 : vector<8x128xf32>
    %c56_33 = arith.constant 56 : index
    %c0_34 = arith.constant 0 : index
    %40 = vector.load %arg12[%c56_33, %c0_34] : memref<64x128xf32, #tpu.memory_space<vmem>>, vector<8x128xf32>
    tpu.vector_store %arg12[%c56_33, %c0_34], %39 {strides = array<i32>} : memref<64x128xf32, #tpu.memory_space<vmem>>, vector<8x128xf32>,
    %c0_35 = arith.constant 0 : index
    %c0_36 = arith.constant 0 : index
    %41 = vector.load %arg4[%c0_35, %c0_36] : memref<32x128xf32, #tpu.memory_space<vmem>>, vector<32x128xf32>
    %cst_37 = arith.constant 0.000000e+00 : f32
    %42 = vector.broadcast %cst_37 : f32 to vector<8x32xf32>
    %c0_i32 = arith.constant 0 : i32
    %c8_i32 = arith.constant 8 : i32
    %43 = arith.muli %c0_i32, %c8_i32 : i32
    %44 = tpu.assume_multiple %43, 8 : i32
    %45 = arith.index_cast %44 : i32 to index
    %c0_38 = arith.constant 0 : index
    %46 = vector.load %arg12[%45, %c0_38] : memref<64x128xf32, #tpu.memory_space<vmem>>, vector<8x128xf32>
    %cst_39 = arith.constant dense<0.000000e+00> : vector<8x128xf32>
    %47 = tpu.matmul %42, %41, %cst_39 {dimension_numbers = #tpu.dot_dimension_numbers<[1], [0], [0], [1], [0, 0, 1, 1], [], []>} : vector<8x32xf32>, vector<32x128xf32>, vector<8x128xf32> -> vector<8x128xf32>
    %48 = arith.addf %46, %47 : vector<8x128xf32>
    %49 = vector.extract_strided_slice %48 {offsets = [0, 0], sizes = [8, 96], strides = [1, 1]} : vector<8x128xf32> to vector<8x96xf32>
    %50 = arith.negf %49 : vector<8x96xf32>
    %51 = math.exp %50 : vector<8x96xf32>
    %cst_40 = arith.constant 1.000000e+00 : f32
    %52 = vector.broadcast %cst_40 : f32 to vector<8x96xf32>
    %53 = arith.addf %52, %51 : vector<8x96xf32>
    %54 = arith.divf %52, %53 : vector<8x96xf32>
    %55 = vector.extract_strided_slice %54 {offsets = [0, 0], sizes = [8, 32], strides = [1, 1]} : vector<8x96xf32> to vector<8x32xf32>
    %56 = vector.extract_strided_slice %54 {offsets = [0, 32], sizes = [8, 32], strides = [1, 1]} : vector<8x96xf32> to vector<8x32xf32>
    %57 = vector.extract_strided_slice %54 {offsets = [0, 64], sizes = [8, 32], strides = [1, 1]} : vector<8x96xf32> to vector<8x32xf32>
    %58 = vector.extract_strided_slice %48 {offsets = [0, 96], sizes = [8, 32], strides = [1, 1]} : vector<8x128xf32> to vector<8x32xf32>
    %59 = math.tanh %58 : vector<8x32xf32>
    %60 = arith.mulf %56, %42 : vector<8x32xf32>
    %61 = arith.mulf %55, %59 : vector<8x32xf32>
    %62 = arith.addf %60, %61 : vector<8x32xf32>
    %63 = math.tanh %62 : vector<8x32xf32>
    %64 = arith.mulf %57, %63 : vector<8x32xf32>
    %65 = arith.index_cast %44 : i32 to index
    %c0_41 = arith.constant 0 : index
    %66 = vector.load %arg13[%65, %c0_41] : memref<64x32xf32, #tpu.memory_space<vmem>>, vector<8x32xf32>
    tpu.vector_store %arg13[%65, %c0_41], %64 {strides = array<i32>} : memref<64x32xf32, #tpu.memory_space<vmem>>, vector<8x32xf32>,
    %c1_i32 = arith.constant 1 : i32
    %c8_i32_42 = arith.constant 8 : i32
    %67 = arith.muli %c1_i32, %c8_i32_42 : i32
    %68 = tpu.assume_multiple %67, 8 : i32
    %69 = arith.index_cast %68 : i32 to index
    %c0_43 = arith.constant 0 : index
    %70 = vector.load %arg12[%69, %c0_43] : memref<64x128xf32, #tpu.memory_space<vmem>>, vector<8x128xf32>
    %cst_44 = arith.constant dense<0.000000e+00> : vector<8x128xf32>
    %71 = tpu.matmul %64, %41, %cst_44 {dimension_numbers = #tpu.dot_dimension_numbers<[1], [0], [0], [1], [0, 0, 1, 1], [], []>} : vector<8x32xf32>, vector<32x128xf32>, vector<8x128xf32> -> vector<8x128xf32>
    %72 = arith.addf %70, %71 : vector<8x128xf32>
    %73 = vector.extract_strided_slice %72 {offsets = [0, 0], sizes = [8, 96], strides = [1, 1]} : vector<8x128xf32> to vector<8x96xf32>
    %74 = arith.negf %73 : vector<8x96xf32>
    %75 = math.exp %74 : vector<8x96xf32>
    %cst_45 = arith.constant 1.000000e+00 : f32
    %76 = vector.broadcast %cst_45 : f32 to vector<8x96xf32>
    %77 = arith.addf %76, %75 : vector<8x96xf32>
    %78 = arith.divf %76, %77 : vector<8x96xf32>
    %79 = vector.extract_strided_slice %78 {offsets = [0, 0], sizes = [8, 32], strides = [1, 1]} : vector<8x96xf32> to vector<8x32xf32>
    %80 = vector.extract_strided_slice %78 {offsets = [0, 32], sizes = [8, 32], strides = [1, 1]} : vector<8x96xf32> to vector<8x32xf32>
    %81 = vector.extract_strided_slice %78 {offsets = [0, 64], sizes = [8, 32], strides = [1, 1]} : vector<8x96xf32> to vector<8x32xf32>
    %82 = vector.extract_strided_slice %72 {offsets = [0, 96], sizes = [8, 32], strides = [1, 1]} : vector<8x128xf32> to vector<8x32xf32>
    %83 = math.tanh %82 : vector<8x32xf32>
    %84 = arith.mulf %80, %62 : vector<8x32xf32>
    %85 = arith.mulf %79, %83 : vector<8x32xf32>
    %86 = arith.addf %84, %85 : vector<8x32xf32>
    %87 = math.tanh %86 : vector<8x32xf32>
    %88 = arith.mulf %81, %87 : vector<8x32xf32>
    %89 = arith.index_cast %68 : i32 to index
    %c0_46 = arith.constant 0 : index
    %90 = vector.load %arg13[%89, %c0_46] : memref<64x32xf32, #tpu.memory_space<vmem>>, vector<8x32xf32>
    tpu.vector_store %arg13[%89, %c0_46], %88 {strides = array<i32>} : memref<64x32xf32, #tpu.memory_space<vmem>>, vector<8x32xf32>,
    %c2_i32 = arith.constant 2 : i32
    %c8_i32_47 = arith.constant 8 : i32
    %91 = arith.muli %c2_i32, %c8_i32_47 : i32
    %92 = tpu.assume_multiple %91, 8 : i32
    %93 = arith.index_cast %92 : i32 to index
    %c0_48 = arith.constant 0 : index
    %94 = vector.load %arg12[%93, %c0_48] : memref<64x128xf32, #tpu.memory_space<vmem>>, vector<8x128xf32>
    %cst_49 = arith.constant dense<0.000000e+00> : vector<8x128xf32>
    %95 = tpu.matmul %88, %41, %cst_49 {dimension_numbers = #tpu.dot_dimension_numbers<[1], [0], [0], [1], [0, 0, 1, 1], [], []>} : vector<8x32xf32>, vector<32x128xf32>, vector<8x128xf32> -> vector<8x128xf32>
    %96 = arith.addf %94, %95 : vector<8x128xf32>
    %97 = vector.extract_strided_slice %96 {offsets = [0, 0], sizes = [8, 96], strides = [1, 1]} : vector<8x128xf32> to vector<8x96xf32>
    %98 = arith.negf %97 : vector<8x96xf32>
    %99 = math.exp %98 : vector<8x96xf32>
    %cst_50 = arith.constant 1.000000e+00 : f32
    %100 = vector.broadcast %cst_50 : f32 to vector<8x96xf32>
    %101 = arith.addf %100, %99 : vector<8x96xf32>
    %102 = arith.divf %100, %101 : vector<8x96xf32>
    %103 = vector.extract_strided_slice %102 {offsets = [0, 0], sizes = [8, 32], strides = [1, 1]} : vector<8x96xf32> to vector<8x32xf32>
    %104 = vector.extract_strided_slice %102 {offsets = [0, 32], sizes = [8, 32], strides = [1, 1]} : vector<8x96xf32> to vector<8x32xf32>
    %105 = vector.extract_strided_slice %102 {offsets = [0, 64], sizes = [8, 32], strides = [1, 1]} : vector<8x96xf32> to vector<8x32xf32>
    %106 = vector.extract_strided_slice %96 {offsets = [0, 96], sizes = [8, 32], strides = [1, 1]} : vector<8x128xf32> to vector<8x32xf32>
    %107 = math.tanh %106 : vector<8x32xf32>
    %108 = arith.mulf %104, %86 : vector<8x32xf32>
    %109 = arith.mulf %103, %107 : vector<8x32xf32>
    %110 = arith.addf %108, %109 : vector<8x32xf32>
    %111 = math.tanh %110 : vector<8x32xf32>
    %112 = arith.mulf %105, %111 : vector<8x32xf32>
    %113 = arith.index_cast %92 : i32 to index
    %c0_51 = arith.constant 0 : index
    %114 = vector.load %arg13[%113, %c0_51] : memref<64x32xf32, #tpu.memory_space<vmem>>, vector<8x32xf32>
    tpu.vector_store %arg13[%113, %c0_51], %112 {strides = array<i32>} : memref<64x32xf32, #tpu.memory_space<vmem>>, vector<8x32xf32>,
    %c3_i32 = arith.constant 3 : i32
    %c8_i32_52 = arith.constant 8 : i32
    %115 = arith.muli %c3_i32, %c8_i32_52 : i32
    %116 = tpu.assume_multiple %115, 8 : i32
    %117 = arith.index_cast %116 : i32 to index
    %c0_53 = arith.constant 0 : index
    %118 = vector.load %arg12[%117, %c0_53] : memref<64x128xf32, #tpu.memory_space<vmem>>, vector<8x128xf32>
    %cst_54 = arith.constant dense<0.000000e+00> : vector<8x128xf32>
    %119 = tpu.matmul %112, %41, %cst_54 {dimension_numbers = #tpu.dot_dimension_numbers<[1], [0], [0], [1], [0, 0, 1, 1], [], []>} : vector<8x32xf32>, vector<32x128xf32>, vector<8x128xf32> -> vector<8x128xf32>
    %120 = arith.addf %118, %119 : vector<8x128xf32>
    %121 = vector.extract_strided_slice %120 {offsets = [0, 0], sizes = [8, 96], strides = [1, 1]} : vector<8x128xf32> to vector<8x96xf32>
    %122 = arith.negf %121 : vector<8x96xf32>
    %123 = math.exp %122 : vector<8x96xf32>
    %cst_55 = arith.constant 1.000000e+00 : f32
    %124 = vector.broadcast %cst_55 : f32 to vector<8x96xf32>
    %125 = arith.addf %124, %123 : vector<8x96xf32>
    %126 = arith.divf %124, %125 : vector<8x96xf32>
    %127 = vector.extract_strided_slice %126 {offsets = [0, 0], sizes = [8, 32], strides = [1, 1]} : vector<8x96xf32> to vector<8x32xf32>
    %128 = vector.extract_strided_slice %126 {offsets = [0, 32], sizes = [8, 32], strides = [1, 1]} : vector<8x96xf32> to vector<8x32xf32>
    %129 = vector.extract_strided_slice %126 {offsets = [0, 64], sizes = [8, 32], strides = [1, 1]} : vector<8x96xf32> to vector<8x32xf32>
    %130 = vector.extract_strided_slice %120 {offsets = [0, 96], sizes = [8, 32], strides = [1, 1]} : vector<8x128xf32> to vector<8x32xf32>
    %131 = math.tanh %130 : vector<8x32xf32>
    %132 = arith.mulf %128, %110 : vector<8x32xf32>
    %133 = arith.mulf %127, %131 : vector<8x32xf32>
    %134 = arith.addf %132, %133 : vector<8x32xf32>
    %135 = math.tanh %134 : vector<8x32xf32>
    %136 = arith.mulf %129, %135 : vector<8x32xf32>
    %137 = arith.index_cast %116 : i32 to index
    %c0_56 = arith.constant 0 : index
    %138 = vector.load %arg13[%137, %c0_56] : memref<64x32xf32, #tpu.memory_space<vmem>>, vector<8x32xf32>
    tpu.vector_store %arg13[%137, %c0_56], %136 {strides = array<i32>} : memref<64x32xf32, #tpu.memory_space<vmem>>, vector<8x32xf32>,
    %c4_i32 = arith.constant 4 : i32
    %c8_i32_57 = arith.constant 8 : i32
    %139 = arith.muli %c4_i32, %c8_i32_57 : i32
    %140 = tpu.assume_multiple %139, 8 : i32
    %141 = arith.index_cast %140 : i32 to index
    %c0_58 = arith.constant 0 : index
    %142 = vector.load %arg12[%141, %c0_58] : memref<64x128xf32, #tpu.memory_space<vmem>>, vector<8x128xf32>
    %cst_59 = arith.constant dense<0.000000e+00> : vector<8x128xf32>
    %143 = tpu.matmul %136, %41, %cst_59 {dimension_numbers = #tpu.dot_dimension_numbers<[1], [0], [0], [1], [0, 0, 1, 1], [], []>} : vector<8x32xf32>, vector<32x128xf32>, vector<8x128xf32> -> vector<8x128xf32>
    %144 = arith.addf %142, %143 : vector<8x128xf32>
    %145 = vector.extract_strided_slice %144 {offsets = [0, 0], sizes = [8, 96], strides = [1, 1]} : vector<8x128xf32> to vector<8x96xf32>
    %146 = arith.negf %145 : vector<8x96xf32>
    %147 = math.exp %146 : vector<8x96xf32>
    %cst_60 = arith.constant 1.000000e+00 : f32
    %148 = vector.broadcast %cst_60 : f32 to vector<8x96xf32>
    %149 = arith.addf %148, %147 : vector<8x96xf32>
    %150 = arith.divf %148, %149 : vector<8x96xf32>
    %151 = vector.extract_strided_slice %150 {offsets = [0, 0], sizes = [8, 32], strides = [1, 1]} : vector<8x96xf32> to vector<8x32xf32>
    %152 = vector.extract_strided_slice %150 {offsets = [0, 32], sizes = [8, 32], strides = [1, 1]} : vector<8x96xf32> to vector<8x32xf32>
    %153 = vector.extract_strided_slice %150 {offsets = [0, 64], sizes = [8, 32], strides = [1, 1]} : vector<8x96xf32> to vector<8x32xf32>
    %154 = vector.extract_strided_slice %144 {offsets = [0, 96], sizes = [8, 32], strides = [1, 1]} : vector<8x128xf32> to vector<8x32xf32>
    %155 = math.tanh %154 : vector<8x32xf32>
    %156 = arith.mulf %152, %134 : vector<8x32xf32>
    %157 = arith.mulf %151, %155 : vector<8x32xf32>
    %158 = arith.addf %156, %157 : vector<8x32xf32>
    %159 = math.tanh %158 : vector<8x32xf32>
    %160 = arith.mulf %153, %159 : vector<8x32xf32>
    %161 = arith.index_cast %140 : i32 to index
    %c0_61 = arith.constant 0 : index
    %162 = vector.load %arg13[%161, %c0_61] : memref<64x32xf32, #tpu.memory_space<vmem>>, vector<8x32xf32>
    tpu.vector_store %arg13[%161, %c0_61], %160 {strides = array<i32>} : memref<64x32xf32, #tpu.memory_space<vmem>>, vector<8x32xf32>,
    %c5_i32 = arith.constant 5 : i32
    %c8_i32_62 = arith.constant 8 : i32
    %163 = arith.muli %c5_i32, %c8_i32_62 : i32
    %164 = tpu.assume_multiple %163, 8 : i32
    %165 = arith.index_cast %164 : i32 to index
    %c0_63 = arith.constant 0 : index
    %166 = vector.load %arg12[%165, %c0_63] : memref<64x128xf32, #tpu.memory_space<vmem>>, vector<8x128xf32>
    %cst_64 = arith.constant dense<0.000000e+00> : vector<8x128xf32>
    %167 = tpu.matmul %160, %41, %cst_64 {dimension_numbers = #tpu.dot_dimension_numbers<[1], [0], [0], [1], [0, 0, 1, 1], [], []>} : vector<8x32xf32>, vector<32x128xf32>, vector<8x128xf32> -> vector<8x128xf32>
    %168 = arith.addf %166, %167 : vector<8x128xf32>
    %169 = vector.extract_strided_slice %168 {offsets = [0, 0], sizes = [8, 96], strides = [1, 1]} : vector<8x128xf32> to vector<8x96xf32>
    %170 = arith.negf %169 : vector<8x96xf32>
    %171 = math.exp %170 : vector<8x96xf32>
    %cst_65 = arith.constant 1.000000e+00 : f32
    %172 = vector.broadcast %cst_65 : f32 to vector<8x96xf32>
    %173 = arith.addf %172, %171 : vector<8x96xf32>
    %174 = arith.divf %172, %173 : vector<8x96xf32>
    %175 = vector.extract_strided_slice %174 {offsets = [0, 0], sizes = [8, 32], strides = [1, 1]} : vector<8x96xf32> to vector<8x32xf32>
    %176 = vector.extract_strided_slice %174 {offsets = [0, 32], sizes = [8, 32], strides = [1, 1]} : vector<8x96xf32> to vector<8x32xf32>
    %177 = vector.extract_strided_slice %174 {offsets = [0, 64], sizes = [8, 32], strides = [1, 1]} : vector<8x96xf32> to vector<8x32xf32>
    %178 = vector.extract_strided_slice %168 {offsets = [0, 96], sizes = [8, 32], strides = [1, 1]} : vector<8x128xf32> to vector<8x32xf32>
    %179 = math.tanh %178 : vector<8x32xf32>
    %180 = arith.mulf %176, %158 : vector<8x32xf32>
    %181 = arith.mulf %175, %179 : vector<8x32xf32>
    %182 = arith.addf %180, %181 : vector<8x32xf32>
    %183 = math.tanh %182 : vector<8x32xf32>
    %184 = arith.mulf %177, %183 : vector<8x32xf32>
    %185 = arith.index_cast %164 : i32 to index
    %c0_66 = arith.constant 0 : index
    %186 = vector.load %arg13[%185, %c0_66] : memref<64x32xf32, #tpu.memory_space<vmem>>, vector<8x32xf32>
    tpu.vector_store %arg13[%185, %c0_66], %184 {strides = array<i32>} : memref<64x32xf32, #tpu.memory_space<vmem>>, vector<8x32xf32>,
    %c6_i32 = arith.constant 6 : i32
    %c8_i32_67 = arith.constant 8 : i32
    %187 = arith.muli %c6_i32, %c8_i32_67 : i32
    %188 = tpu.assume_multiple %187, 8 : i32
    %189 = arith.index_cast %188 : i32 to index
    %c0_68 = arith.constant 0 : index
    %190 = vector.load %arg12[%189, %c0_68] : memref<64x128xf32, #tpu.memory_space<vmem>>, vector<8x128xf32>
    %cst_69 = arith.constant dense<0.000000e+00> : vector<8x128xf32>
    %191 = tpu.matmul %184, %41, %cst_69 {dimension_numbers = #tpu.dot_dimension_numbers<[1], [0], [0], [1], [0, 0, 1, 1], [], []>} : vector<8x32xf32>, vector<32x128xf32>, vector<8x128xf32> -> vector<8x128xf32>
    %192 = arith.addf %190, %191 : vector<8x128xf32>
    %193 = vector.extract_strided_slice %192 {offsets = [0, 0], sizes = [8, 96], strides = [1, 1]} : vector<8x128xf32> to vector<8x96xf32>
    %194 = arith.negf %193 : vector<8x96xf32>
    %195 = math.exp %194 : vector<8x96xf32>
    %cst_70 = arith.constant 1.000000e+00 : f32
    %196 = vector.broadcast %cst_70 : f32 to vector<8x96xf32>
    %197 = arith.addf %196, %195 : vector<8x96xf32>
    %198 = arith.divf %196, %197 : vector<8x96xf32>
    %199 = vector.extract_strided_slice %198 {offsets = [0, 0], sizes = [8, 32], strides = [1, 1]} : vector<8x96xf32> to vector<8x32xf32>
    %200 = vector.extract_strided_slice %198 {offsets = [0, 32], sizes = [8, 32], strides = [1, 1]} : vector<8x96xf32> to vector<8x32xf32>
    %201 = vector.extract_strided_slice %198 {offsets = [0, 64], sizes = [8, 32], strides = [1, 1]} : vector<8x96xf32> to vector<8x32xf32>
    %202 = vector.extract_strided_slice %192 {offsets = [0, 96], sizes = [8, 32], strides = [1, 1]} : vector<8x128xf32> to vector<8x32xf32>
    %203 = math.tanh %202 : vector<8x32xf32>
    %204 = arith.mulf %200, %182 : vector<8x32xf32>
    %205 = arith.mulf %199, %203 : vector<8x32xf32>
    %206 = arith.addf %204, %205 : vector<8x32xf32>
    %207 = math.tanh %206 : vector<8x32xf32>
    %208 = arith.mulf %201, %207 : vector<8x32xf32>
    %209 = arith.index_cast %188 : i32 to index
    %c0_71 = arith.constant 0 : index
    %210 = vector.load %arg13[%209, %c0_71] : memref<64x32xf32, #tpu.memory_space<vmem>>, vector<8x32xf32>
    tpu.vector_store %arg13[%209, %c0_71], %208 {strides = array<i32>} : memref<64x32xf32, #tpu.memory_space<vmem>>, vector<8x32xf32>,
    %c7_i32 = arith.constant 7 : i32
    %c8_i32_72 = arith.constant 8 : i32
    %211 = arith.muli %c7_i32, %c8_i32_72 : i32
    %212 = tpu.assume_multiple %211, 8 : i32
    %213 = arith.index_cast %212 : i32 to index
    %c0_73 = arith.constant 0 : index
    %214 = vector.load %arg12[%213, %c0_73] : memref<64x128xf32, #tpu.memory_space<vmem>>, vector<8x128xf32>
    %cst_74 = arith.constant dense<0.000000e+00> : vector<8x128xf32>
    %215 = tpu.matmul %208, %41, %cst_74 {dimension_numbers = #tpu.dot_dimension_numbers<[1], [0], [0], [1], [0, 0, 1, 1], [], []>} : vector<8x32xf32>, vector<32x128xf32>, vector<8x128xf32> -> vector<8x128xf32>
    %216 = arith.addf %214, %215 : vector<8x128xf32>
    %217 = vector.extract_strided_slice %216 {offsets = [0, 0], sizes = [8, 96], strides = [1, 1]} : vector<8x128xf32> to vector<8x96xf32>
    %218 = arith.negf %217 : vector<8x96xf32>
    %219 = math.exp %218 : vector<8x96xf32>
    %cst_75 = arith.constant 1.000000e+00 : f32
    %220 = vector.broadcast %cst_75 : f32 to vector<8x96xf32>
    %221 = arith.addf %220, %219 : vector<8x96xf32>
    %222 = arith.divf %220, %221 : vector<8x96xf32>
    %223 = vector.extract_strided_slice %222 {offsets = [0, 0], sizes = [8, 32], strides = [1, 1]} : vector<8x96xf32> to vector<8x32xf32>
    %224 = vector.extract_strided_slice %222 {offsets = [0, 32], sizes = [8, 32], strides = [1, 1]} : vector<8x96xf32> to vector<8x32xf32>
    %225 = vector.extract_strided_slice %222 {offsets = [0, 64], sizes = [8, 32], strides = [1, 1]} : vector<8x96xf32> to vector<8x32xf32>
    %226 = vector.extract_strided_slice %216 {offsets = [0, 96], sizes = [8, 32], strides = [1, 1]} : vector<8x128xf32> to vector<8x32xf32>
    %227 = math.tanh %226 : vector<8x32xf32>
    %228 = arith.mulf %224, %206 : vector<8x32xf32>
    %229 = arith.mulf %223, %227 : vector<8x32xf32>
    %230 = arith.addf %228, %229 : vector<8x32xf32>
    %231 = math.tanh %230 : vector<8x32xf32>
    %232 = arith.mulf %225, %231 : vector<8x32xf32>
    %233 = arith.index_cast %212 : i32 to index
    %c0_76 = arith.constant 0 : index
    %234 = vector.load %arg13[%233, %c0_76] : memref<64x32xf32, #tpu.memory_space<vmem>>, vector<8x32xf32>
    tpu.vector_store %arg13[%233, %c0_76], %232 {strides = array<i32>} : memref<64x32xf32, #tpu.memory_space<vmem>>, vector<8x32xf32>,
    %c8_i32_77 = arith.constant 8 : i32
    %c0_78 = arith.constant 0 : index
    %c0_79 = arith.constant 0 : index
    %235 = vector.load %arg13[%c0_78, %c0_79] : memref<64x32xf32, #tpu.memory_space<vmem>>, vector<64x32xf32>
    %c0_80 = arith.constant 0 : index
    %c0_81 = arith.constant 0 : index
    %236 = vector.load %arg7[%c0_80, %c0_81] : memref<1x128xf32, #tpu.memory_space<vmem>>, vector<1x128xf32>
    %c0_82 = arith.constant 0 : index
    %c0_83 = arith.constant 0 : index
    %237 = vector.load %arg5[%c0_82, %c0_83] : memref<32x128xf32, #tpu.memory_space<vmem>>, vector<32x128xf32>
    %cst_84 = arith.constant dense<0.000000e+00> : vector<64x128xf32>
    %238 = tpu.matmul %235, %237, %cst_84 {dimension_numbers = #tpu.dot_dimension_numbers<[1], [0], [0], [1], [0, 0, 1, 1], [], []>} : vector<64x32xf32>, vector<32x128xf32>, vector<64x128xf32> -> vector<64x128xf32>
    %239 = vector.broadcast %236 : vector<1x128xf32> to vector<64x128xf32>
    %240 = arith.addf %239, %238 : vector<64x128xf32>
    %c0_85 = arith.constant 0 : index
    %c0_86 = arith.constant 0 : index
    %241 = vector.load %arg12[%c0_85, %c0_86] : memref<64x128xf32, #tpu.memory_space<vmem>>, vector<64x128xf32>
    tpu.vector_store %arg12[%c0_85, %c0_86], %240 {strides = array<i32>} : memref<64x128xf32, #tpu.memory_space<vmem>>, vector<64x128xf32>,
    %c0_87 = arith.constant 0 : index
    %c0_88 = arith.constant 0 : index
    %242 = vector.load %arg6[%c0_87, %c0_88] : memref<32x128xf32, #tpu.memory_space<vmem>>, vector<32x128xf32>
    %cst_89 = arith.constant dense<0.000000e+00> : vector<64x128xf32>
    %243 = tpu.matmul %235, %242, %cst_89 {dimension_numbers = #tpu.dot_dimension_numbers<[1], [0], [0], [1], [0, 0, 1, 1], [], []>} : vector<64x32xf32>, vector<32x128xf32>, vector<64x128xf32> -> vector<64x128xf32>
    %c0_90 = arith.constant 0 : index
    %c0_91 = arith.constant 0 : index
    %244 = vector.load %arg12[%c0_90, %c0_91] : memref<64x128xf32, #tpu.memory_space<vmem>>, vector<8x128xf32>
    %245 = vector.extract_strided_slice %243 {offsets = [56, 0], sizes = [8, 128], strides = [1, 1]} : vector<64x128xf32> to vector<8x128xf32>
    %246 = arith.addf %244, %245 : vector<8x128xf32>
    %c0_92 = arith.constant 0 : index
    %c0_93 = arith.constant 0 : index
    %247 = vector.load %arg12[%c0_92, %c0_93] : memref<64x128xf32, #tpu.memory_space<vmem>>, vector<8x128xf32>
    tpu.vector_store %arg12[%c0_92, %c0_93], %246 {strides = array<i32>} : memref<64x128xf32, #tpu.memory_space<vmem>>, vector<8x128xf32>,
    %c8_94 = arith.constant 8 : index
    %c0_95 = arith.constant 0 : index
    %248 = vector.load %arg12[%c8_94, %c0_95] : memref<64x128xf32, #tpu.memory_space<vmem>>, vector<8x128xf32>
    %249 = vector.extract_strided_slice %243 {offsets = [48, 0], sizes = [8, 128], strides = [1, 1]} : vector<64x128xf32> to vector<8x128xf32>
    %250 = arith.addf %248, %249 : vector<8x128xf32>
    %c8_96 = arith.constant 8 : index
    %c0_97 = arith.constant 0 : index
    %251 = vector.load %arg12[%c8_96, %c0_97] : memref<64x128xf32, #tpu.memory_space<vmem>>, vector<8x128xf32>
    tpu.vector_store %arg12[%c8_96, %c0_97], %250 {strides = array<i32>} : memref<64x128xf32, #tpu.memory_space<vmem>>, vector<8x128xf32>,
    %c16_98 = arith.constant 16 : index
    %c0_99 = arith.constant 0 : index
    %252 = vector.load %arg12[%c16_98, %c0_99] : memref<64x128xf32, #tpu.memory_space<vmem>>, vector<8x128xf32>
    %253 = vector.extract_strided_slice %243 {offsets = [40, 0], sizes = [8, 128], strides = [1, 1]} : vector<64x128xf32> to vector<8x128xf32>
    %254 = arith.addf %252, %253 : vector<8x128xf32>
    %c16_100 = arith.constant 16 : index
    %c0_101 = arith.constant 0 : index
    %255 = vector.load %arg12[%c16_100, %c0_101] : memref<64x128xf32, #tpu.memory_space<vmem>>, vector<8x128xf32>
    tpu.vector_store %arg12[%c16_100, %c0_101], %254 {strides = array<i32>} : memref<64x128xf32, #tpu.memory_space<vmem>>, vector<8x128xf32>,
    %c24_102 = arith.constant 24 : index
    %c0_103 = arith.constant 0 : index
    %256 = vector.load %arg12[%c24_102, %c0_103] : memref<64x128xf32, #tpu.memory_space<vmem>>, vector<8x128xf32>
    %257 = vector.extract_strided_slice %243 {offsets = [32, 0], sizes = [8, 128], strides = [1, 1]} : vector<64x128xf32> to vector<8x128xf32>
    %258 = arith.addf %256, %257 : vector<8x128xf32>
    %c24_104 = arith.constant 24 : index
    %c0_105 = arith.constant 0 : index
    %259 = vector.load %arg12[%c24_104, %c0_105] : memref<64x128xf32, #tpu.memory_space<vmem>>, vector<8x128xf32>
    tpu.vector_store %arg12[%c24_104, %c0_105], %258 {strides = array<i32>} : memref<64x128xf32, #tpu.memory_space<vmem>>, vector<8x128xf32>,
    %c32_106 = arith.constant 32 : index
    %c0_107 = arith.constant 0 : index
    %260 = vector.load %arg12[%c32_106, %c0_107] : memref<64x128xf32, #tpu.memory_space<vmem>>, vector<8x128xf32>
    %261 = vector.extract_strided_slice %243 {offsets = [24, 0], sizes = [8, 128], strides = [1, 1]} : vector<64x128xf32> to vector<8x128xf32>
    %262 = arith.addf %260, %261 : vector<8x128xf32>
    %c32_108 = arith.constant 32 : index
    %c0_109 = arith.constant 0 : index
    %263 = vector.load %arg12[%c32_108, %c0_109] : memref<64x128xf32, #tpu.memory_space<vmem>>, vector<8x128xf32>
    tpu.vector_store %arg12[%c32_108, %c0_109], %262 {strides = array<i32>} : memref<64x128xf32, #tpu.memory_space<vmem>>, vector<8x128xf32>,
    %c40_110 = arith.constant 40 : index
    %c0_111 = arith.constant 0 : index
    %264 = vector.load %arg12[%c40_110, %c0_111] : memref<64x128xf32, #tpu.memory_space<vmem>>, vector<8x128xf32>
    %265 = vector.extract_strided_slice %243 {offsets = [16, 0], sizes = [8, 128], strides = [1, 1]} : vector<64x128xf32> to vector<8x128xf32>
    %266 = arith.addf %264, %265 : vector<8x128xf32>
    %c40_112 = arith.constant 40 : index
    %c0_113 = arith.constant 0 : index
    %267 = vector.load %arg12[%c40_112, %c0_113] : memref<64x128xf32, #tpu.memory_space<vmem>>, vector<8x128xf32>
    tpu.vector_store %arg12[%c40_112, %c0_113], %266 {strides = array<i32>} : memref<64x128xf32, #tpu.memory_space<vmem>>, vector<8x128xf32>,
    %c48_114 = arith.constant 48 : index
    %c0_115 = arith.constant 0 : index
    %268 = vector.load %arg12[%c48_114, %c0_115] : memref<64x128xf32, #tpu.memory_space<vmem>>, vector<8x128xf32>
    %269 = vector.extract_strided_slice %243 {offsets = [8, 0], sizes = [8, 128], strides = [1, 1]} : vector<64x128xf32> to vector<8x128xf32>
    %270 = arith.addf %268, %269 : vector<8x128xf32>
    %c48_116 = arith.constant 48 : index
    %c0_117 = arith.constant 0 : index
    %271 = vector.load %arg12[%c48_116, %c0_117] : memref<64x128xf32, #tpu.memory_space<vmem>>, vector<8x128xf32>
    tpu.vector_store %arg12[%c48_116, %c0_117], %270 {strides = array<i32>} : memref<64x128xf32, #tpu.memory_space<vmem>>, vector<8x128xf32>,
    %c56_118 = arith.constant 56 : index
    %c0_119 = arith.constant 0 : index
    %272 = vector.load %arg12[%c56_118, %c0_119] : memref<64x128xf32, #tpu.memory_space<vmem>>, vector<8x128xf32>
    %273 = vector.extract_strided_slice %243 {offsets = [0, 0], sizes = [8, 128], strides = [1, 1]} : vector<64x128xf32> to vector<8x128xf32>
    %274 = arith.addf %272, %273 : vector<8x128xf32>
    %c56_120 = arith.constant 56 : index
    %c0_121 = arith.constant 0 : index
    %275 = vector.load %arg12[%c56_120, %c0_121] : memref<64x128xf32, #tpu.memory_space<vmem>>, vector<8x128xf32>
    tpu.vector_store %arg12[%c56_120, %c0_121], %274 {strides = array<i32>} : memref<64x128xf32, #tpu.memory_space<vmem>>, vector<8x128xf32>,
    %c0_122 = arith.constant 0 : index
    %c0_123 = arith.constant 0 : index
    %276 = vector.load %arg8[%c0_122, %c0_123] : memref<32x128xf32, #tpu.memory_space<vmem>>, vector<32x128xf32>
    %cst_124 = arith.constant 0.000000e+00 : f32
    %277 = vector.broadcast %cst_124 : f32 to vector<8x32xf32>
    %c0_i32_125 = arith.constant 0 : i32
    %c8_i32_126 = arith.constant 8 : i32
    %278 = arith.muli %c0_i32_125, %c8_i32_126 : i32
    %279 = tpu.assume_multiple %278, 8 : i32
    %280 = arith.index_cast %279 : i32 to index
    %c0_127 = arith.constant 0 : index
    %281 = vector.load %arg12[%280, %c0_127] : memref<64x128xf32, #tpu.memory_space<vmem>>, vector<8x128xf32>
    %cst_128 = arith.constant dense<0.000000e+00> : vector<8x128xf32>
    %282 = tpu.matmul %277, %276, %cst_128 {dimension_numbers = #tpu.dot_dimension_numbers<[1], [0], [0], [1], [0, 0, 1, 1], [], []>} : vector<8x32xf32>, vector<32x128xf32>, vector<8x128xf32> -> vector<8x128xf32>
    %283 = arith.addf %281, %282 : vector<8x128xf32>
    %284 = vector.extract_strided_slice %283 {offsets = [0, 0], sizes = [8, 96], strides = [1, 1]} : vector<8x128xf32> to vector<8x96xf32>
    %285 = arith.negf %284 : vector<8x96xf32>
    %286 = math.exp %285 : vector<8x96xf32>
    %cst_129 = arith.constant 1.000000e+00 : f32
    %287 = vector.broadcast %cst_129 : f32 to vector<8x96xf32>
    %288 = arith.addf %287, %286 : vector<8x96xf32>
    %289 = arith.divf %287, %288 : vector<8x96xf32>
    %290 = vector.extract_strided_slice %289 {offsets = [0, 0], sizes = [8, 32], strides = [1, 1]} : vector<8x96xf32> to vector<8x32xf32>
    %291 = vector.extract_strided_slice %289 {offsets = [0, 32], sizes = [8, 32], strides = [1, 1]} : vector<8x96xf32> to vector<8x32xf32>
    %292 = vector.extract_strided_slice %289 {offsets = [0, 64], sizes = [8, 32], strides = [1, 1]} : vector<8x96xf32> to vector<8x32xf32>
    %293 = vector.extract_strided_slice %283 {offsets = [0, 96], sizes = [8, 32], strides = [1, 1]} : vector<8x128xf32> to vector<8x32xf32>
    %294 = math.tanh %293 : vector<8x32xf32>
    %295 = arith.mulf %291, %277 : vector<8x32xf32>
    %296 = arith.mulf %290, %294 : vector<8x32xf32>
    %297 = arith.addf %295, %296 : vector<8x32xf32>
    %298 = math.tanh %297 : vector<8x32xf32>
    %299 = arith.mulf %292, %298 : vector<8x32xf32>
    %300 = arith.addf %277, %299 : vector<8x32xf32>
    %c1_i32_130 = arith.constant 1 : i32
    %c8_i32_131 = arith.constant 8 : i32
    %301 = arith.muli %c1_i32_130, %c8_i32_131 : i32
    %302 = tpu.assume_multiple %301, 8 : i32
    %303 = arith.index_cast %302 : i32 to index
    %c0_132 = arith.constant 0 : index
    %304 = vector.load %arg12[%303, %c0_132] : memref<64x128xf32, #tpu.memory_space<vmem>>, vector<8x128xf32>
    %cst_133 = arith.constant dense<0.000000e+00> : vector<8x128xf32>
    %305 = tpu.matmul %299, %276, %cst_133 {dimension_numbers = #tpu.dot_dimension_numbers<[1], [0], [0], [1], [0, 0, 1, 1], [], []>} : vector<8x32xf32>, vector<32x128xf32>, vector<8x128xf32> -> vector<8x128xf32>
    %306 = arith.addf %304, %305 : vector<8x128xf32>
    %307 = vector.extract_strided_slice %306 {offsets = [0, 0], sizes = [8, 96], strides = [1, 1]} : vector<8x128xf32> to vector<8x96xf32>
    %308 = arith.negf %307 : vector<8x96xf32>
    %309 = math.exp %308 : vector<8x96xf32>
    %cst_134 = arith.constant 1.000000e+00 : f32
    %310 = vector.broadcast %cst_134 : f32 to vector<8x96xf32>
    %311 = arith.addf %310, %309 : vector<8x96xf32>
    %312 = arith.divf %310, %311 : vector<8x96xf32>
    %313 = vector.extract_strided_slice %312 {offsets = [0, 0], sizes = [8, 32], strides = [1, 1]} : vector<8x96xf32> to vector<8x32xf32>
    %314 = vector.extract_strided_slice %312 {offsets = [0, 32], sizes = [8, 32], strides = [1, 1]} : vector<8x96xf32> to vector<8x32xf32>
    %315 = vector.extract_strided_slice %312 {offsets = [0, 64], sizes = [8, 32], strides = [1, 1]} : vector<8x96xf32> to vector<8x32xf32>
    %316 = vector.extract_strided_slice %306 {offsets = [0, 96], sizes = [8, 32], strides = [1, 1]} : vector<8x128xf32> to vector<8x32xf32>
    %317 = math.tanh %316 : vector<8x32xf32>
    %318 = arith.mulf %314, %297 : vector<8x32xf32>
    %319 = arith.mulf %313, %317 : vector<8x32xf32>
    %320 = arith.addf %318, %319 : vector<8x32xf32>
    %321 = math.tanh %320 : vector<8x32xf32>
    %322 = arith.mulf %315, %321 : vector<8x32xf32>
    %323 = arith.addf %300, %322 : vector<8x32xf32>
    %c2_i32_135 = arith.constant 2 : i32
    %c8_i32_136 = arith.constant 8 : i32
    %324 = arith.muli %c2_i32_135, %c8_i32_136 : i32
    %325 = tpu.assume_multiple %324, 8 : i32
    %326 = arith.index_cast %325 : i32 to index
    %c0_137 = arith.constant 0 : index
    %327 = vector.load %arg12[%326, %c0_137] : memref<64x128xf32, #tpu.memory_space<vmem>>, vector<8x128xf32>
    %cst_138 = arith.constant dense<0.000000e+00> : vector<8x128xf32>
    %328 = tpu.matmul %322, %276, %cst_138 {dimension_numbers = #tpu.dot_dimension_numbers<[1], [0], [0], [1], [0, 0, 1, 1], [], []>} : vector<8x32xf32>, vector<32x128xf32>, vector<8x128xf32> -> vector<8x128xf32>
    %329 = arith.addf %327, %328 : vector<8x128xf32>
    %330 = vector.extract_strided_slice %329 {offsets = [0, 0], sizes = [8, 96], strides = [1, 1]} : vector<8x128xf32> to vector<8x96xf32>
    %331 = arith.negf %330 : vector<8x96xf32>
    %332 = math.exp %331 : vector<8x96xf32>
    %cst_139 = arith.constant 1.000000e+00 : f32
    %333 = vector.broadcast %cst_139 : f32 to vector<8x96xf32>
    %334 = arith.addf %333, %332 : vector<8x96xf32>
    %335 = arith.divf %333, %334 : vector<8x96xf32>
    %336 = vector.extract_strided_slice %335 {offsets = [0, 0], sizes = [8, 32], strides = [1, 1]} : vector<8x96xf32> to vector<8x32xf32>
    %337 = vector.extract_strided_slice %335 {offsets = [0, 32], sizes = [8, 32], strides = [1, 1]} : vector<8x96xf32> to vector<8x32xf32>
    %338 = vector.extract_strided_slice %335 {offsets = [0, 64], sizes = [8, 32], strides = [1, 1]} : vector<8x96xf32> to vector<8x32xf32>
    %339 = vector.extract_strided_slice %329 {offsets = [0, 96], sizes = [8, 32], strides = [1, 1]} : vector<8x128xf32> to vector<8x32xf32>
    %340 = math.tanh %339 : vector<8x32xf32>
    %341 = arith.mulf %337, %320 : vector<8x32xf32>
    %342 = arith.mulf %336, %340 : vector<8x32xf32>
    %343 = arith.addf %341, %342 : vector<8x32xf32>
    %344 = math.tanh %343 : vector<8x32xf32>
    %345 = arith.mulf %338, %344 : vector<8x32xf32>
    %346 = arith.addf %323, %345 : vector<8x32xf32>
    %c3_i32_140 = arith.constant 3 : i32
    %c8_i32_141 = arith.constant 8 : i32
    %347 = arith.muli %c3_i32_140, %c8_i32_141 : i32
    %348 = tpu.assume_multiple %347, 8 : i32
    %349 = arith.index_cast %348 : i32 to index
    %c0_142 = arith.constant 0 : index
    %350 = vector.load %arg12[%349, %c0_142] : memref<64x128xf32, #tpu.memory_space<vmem>>, vector<8x128xf32>
    %cst_143 = arith.constant dense<0.000000e+00> : vector<8x128xf32>
    %351 = tpu.matmul %345, %276, %cst_143 {dimension_numbers = #tpu.dot_dimension_numbers<[1], [0], [0], [1], [0, 0, 1, 1], [], []>} : vector<8x32xf32>, vector<32x128xf32>, vector<8x128xf32> -> vector<8x128xf32>
    %352 = arith.addf %350, %351 : vector<8x128xf32>
    %353 = vector.extract_strided_slice %352 {offsets = [0, 0], sizes = [8, 96], strides = [1, 1]} : vector<8x128xf32> to vector<8x96xf32>
    %354 = arith.negf %353 : vector<8x96xf32>
    %355 = math.exp %354 : vector<8x96xf32>
    %cst_144 = arith.constant 1.000000e+00 : f32
    %356 = vector.broadcast %cst_144 : f32 to vector<8x96xf32>
    %357 = arith.addf %356, %355 : vector<8x96xf32>
    %358 = arith.divf %356, %357 : vector<8x96xf32>
    %359 = vector.extract_strided_slice %358 {offsets = [0, 0], sizes = [8, 32], strides = [1, 1]} : vector<8x96xf32> to vector<8x32xf32>
    %360 = vector.extract_strided_slice %358 {offsets = [0, 32], sizes = [8, 32], strides = [1, 1]} : vector<8x96xf32> to vector<8x32xf32>
    %361 = vector.extract_strided_slice %358 {offsets = [0, 64], sizes = [8, 32], strides = [1, 1]} : vector<8x96xf32> to vector<8x32xf32>
    %362 = vector.extract_strided_slice %352 {offsets = [0, 96], sizes = [8, 32], strides = [1, 1]} : vector<8x128xf32> to vector<8x32xf32>
    %363 = math.tanh %362 : vector<8x32xf32>
    %364 = arith.mulf %360, %343 : vector<8x32xf32>
    %365 = arith.mulf %359, %363 : vector<8x32xf32>
    %366 = arith.addf %364, %365 : vector<8x32xf32>
    %367 = math.tanh %366 : vector<8x32xf32>
    %368 = arith.mulf %361, %367 : vector<8x32xf32>
    %369 = arith.addf %346, %368 : vector<8x32xf32>
    %c4_i32_145 = arith.constant 4 : i32
    %c8_i32_146 = arith.constant 8 : i32
    %370 = arith.muli %c4_i32_145, %c8_i32_146 : i32
    %371 = tpu.assume_multiple %370, 8 : i32
    %372 = arith.index_cast %371 : i32 to index
    %c0_147 = arith.constant 0 : index
    %373 = vector.load %arg12[%372, %c0_147] : memref<64x128xf32, #tpu.memory_space<vmem>>, vector<8x128xf32>
    %cst_148 = arith.constant dense<0.000000e+00> : vector<8x128xf32>
    %374 = tpu.matmul %368, %276, %cst_148 {dimension_numbers = #tpu.dot_dimension_numbers<[1], [0], [0], [1], [0, 0, 1, 1], [], []>} : vector<8x32xf32>, vector<32x128xf32>, vector<8x128xf32> -> vector<8x128xf32>
    %375 = arith.addf %373, %374 : vector<8x128xf32>
    %376 = vector.extract_strided_slice %375 {offsets = [0, 0], sizes = [8, 96], strides = [1, 1]} : vector<8x128xf32> to vector<8x96xf32>
    %377 = arith.negf %376 : vector<8x96xf32>
    %378 = math.exp %377 : vector<8x96xf32>
    %cst_149 = arith.constant 1.000000e+00 : f32
    %379 = vector.broadcast %cst_149 : f32 to vector<8x96xf32>
    %380 = arith.addf %379, %378 : vector<8x96xf32>
    %381 = arith.divf %379, %380 : vector<8x96xf32>
    %382 = vector.extract_strided_slice %381 {offsets = [0, 0], sizes = [8, 32], strides = [1, 1]} : vector<8x96xf32> to vector<8x32xf32>
    %383 = vector.extract_strided_slice %381 {offsets = [0, 32], sizes = [8, 32], strides = [1, 1]} : vector<8x96xf32> to vector<8x32xf32>
    %384 = vector.extract_strided_slice %381 {offsets = [0, 64], sizes = [8, 32], strides = [1, 1]} : vector<8x96xf32> to vector<8x32xf32>
    %385 = vector.extract_strided_slice %375 {offsets = [0, 96], sizes = [8, 32], strides = [1, 1]} : vector<8x128xf32> to vector<8x32xf32>
    %386 = math.tanh %385 : vector<8x32xf32>
    %387 = arith.mulf %383, %366 : vector<8x32xf32>
    %388 = arith.mulf %382, %386 : vector<8x32xf32>
    %389 = arith.addf %387, %388 : vector<8x32xf32>
    %390 = math.tanh %389 : vector<8x32xf32>
    %391 = arith.mulf %384, %390 : vector<8x32xf32>
    %392 = arith.addf %369, %391 : vector<8x32xf32>
    %c5_i32_150 = arith.constant 5 : i32
    %c8_i32_151 = arith.constant 8 : i32
    %393 = arith.muli %c5_i32_150, %c8_i32_151 : i32
    %394 = tpu.assume_multiple %393, 8 : i32
    %395 = arith.index_cast %394 : i32 to index
    %c0_152 = arith.constant 0 : index
    %396 = vector.load %arg12[%395, %c0_152] : memref<64x128xf32, #tpu.memory_space<vmem>>, vector<8x128xf32>
    %cst_153 = arith.constant dense<0.000000e+00> : vector<8x128xf32>
    %397 = tpu.matmul %391, %276, %cst_153 {dimension_numbers = #tpu.dot_dimension_numbers<[1], [0], [0], [1], [0, 0, 1, 1], [], []>} : vector<8x32xf32>, vector<32x128xf32>, vector<8x128xf32> -> vector<8x128xf32>
    %398 = arith.addf %396, %397 : vector<8x128xf32>
    %399 = vector.extract_strided_slice %398 {offsets = [0, 0], sizes = [8, 96], strides = [1, 1]} : vector<8x128xf32> to vector<8x96xf32>
    %400 = arith.negf %399 : vector<8x96xf32>
    %401 = math.exp %400 : vector<8x96xf32>
    %cst_154 = arith.constant 1.000000e+00 : f32
    %402 = vector.broadcast %cst_154 : f32 to vector<8x96xf32>
    %403 = arith.addf %402, %401 : vector<8x96xf32>
    %404 = arith.divf %402, %403 : vector<8x96xf32>
    %405 = vector.extract_strided_slice %404 {offsets = [0, 0], sizes = [8, 32], strides = [1, 1]} : vector<8x96xf32> to vector<8x32xf32>
    %406 = vector.extract_strided_slice %404 {offsets = [0, 32], sizes = [8, 32], strides = [1, 1]} : vector<8x96xf32> to vector<8x32xf32>
    %407 = vector.extract_strided_slice %404 {offsets = [0, 64], sizes = [8, 32], strides = [1, 1]} : vector<8x96xf32> to vector<8x32xf32>
    %408 = vector.extract_strided_slice %398 {offsets = [0, 96], sizes = [8, 32], strides = [1, 1]} : vector<8x128xf32> to vector<8x32xf32>
    %409 = math.tanh %408 : vector<8x32xf32>
    %410 = arith.mulf %406, %389 : vector<8x32xf32>
    %411 = arith.mulf %405, %409 : vector<8x32xf32>
    %412 = arith.addf %410, %411 : vector<8x32xf32>
    %413 = math.tanh %412 : vector<8x32xf32>
    %414 = arith.mulf %407, %413 : vector<8x32xf32>
    %415 = arith.addf %392, %414 : vector<8x32xf32>
    %c6_i32_155 = arith.constant 6 : i32
    %c8_i32_156 = arith.constant 8 : i32
    %416 = arith.muli %c6_i32_155, %c8_i32_156 : i32
    %417 = tpu.assume_multiple %416, 8 : i32
    %418 = arith.index_cast %417 : i32 to index
    %c0_157 = arith.constant 0 : index
    %419 = vector.load %arg12[%418, %c0_157] : memref<64x128xf32, #tpu.memory_space<vmem>>, vector<8x128xf32>
    %cst_158 = arith.constant dense<0.000000e+00> : vector<8x128xf32>
    %420 = tpu.matmul %414, %276, %cst_158 {dimension_numbers = #tpu.dot_dimension_numbers<[1], [0], [0], [1], [0, 0, 1, 1], [], []>} : vector<8x32xf32>, vector<32x128xf32>, vector<8x128xf32> -> vector<8x128xf32>
    %421 = arith.addf %419, %420 : vector<8x128xf32>
    %422 = vector.extract_strided_slice %421 {offsets = [0, 0], sizes = [8, 96], strides = [1, 1]} : vector<8x128xf32> to vector<8x96xf32>
    %423 = arith.negf %422 : vector<8x96xf32>
    %424 = math.exp %423 : vector<8x96xf32>
    %cst_159 = arith.constant 1.000000e+00 : f32
    %425 = vector.broadcast %cst_159 : f32 to vector<8x96xf32>
    %426 = arith.addf %425, %424 : vector<8x96xf32>
    %427 = arith.divf %425, %426 : vector<8x96xf32>
    %428 = vector.extract_strided_slice %427 {offsets = [0, 0], sizes = [8, 32], strides = [1, 1]} : vector<8x96xf32> to vector<8x32xf32>
    %429 = vector.extract_strided_slice %427 {offsets = [0, 32], sizes = [8, 32], strides = [1, 1]} : vector<8x96xf32> to vector<8x32xf32>
    %430 = vector.extract_strided_slice %427 {offsets = [0, 64], sizes = [8, 32], strides = [1, 1]} : vector<8x96xf32> to vector<8x32xf32>
    %431 = vector.extract_strided_slice %421 {offsets = [0, 96], sizes = [8, 32], strides = [1, 1]} : vector<8x128xf32> to vector<8x32xf32>
    %432 = math.tanh %431 : vector<8x32xf32>
    %433 = arith.mulf %429, %412 : vector<8x32xf32>
    %434 = arith.mulf %428, %432 : vector<8x32xf32>
    %435 = arith.addf %433, %434 : vector<8x32xf32>
    %436 = math.tanh %435 : vector<8x32xf32>
    %437 = arith.mulf %430, %436 : vector<8x32xf32>
    %438 = arith.addf %415, %437 : vector<8x32xf32>
    %c7_i32_160 = arith.constant 7 : i32
    %c8_i32_161 = arith.constant 8 : i32
    %439 = arith.muli %c7_i32_160, %c8_i32_161 : i32
    %440 = tpu.assume_multiple %439, 8 : i32
    %441 = arith.index_cast %440 : i32 to index
    %c0_162 = arith.constant 0 : index
    %442 = vector.load %arg12[%441, %c0_162] : memref<64x128xf32, #tpu.memory_space<vmem>>, vector<8x128xf32>
    %cst_163 = arith.constant dense<0.000000e+00> : vector<8x128xf32>
    %443 = tpu.matmul %437, %276, %cst_163 {dimension_numbers = #tpu.dot_dimension_numbers<[1], [0], [0], [1], [0, 0, 1, 1], [], []>} : vector<8x32xf32>, vector<32x128xf32>, vector<8x128xf32> -> vector<8x128xf32>
    %444 = arith.addf %442, %443 : vector<8x128xf32>
    %445 = vector.extract_strided_slice %444 {offsets = [0, 0], sizes = [8, 96], strides = [1, 1]} : vector<8x128xf32> to vector<8x96xf32>
    %446 = arith.negf %445 : vector<8x96xf32>
    %447 = math.exp %446 : vector<8x96xf32>
    %cst_164 = arith.constant 1.000000e+00 : f32
    %448 = vector.broadcast %cst_164 : f32 to vector<8x96xf32>
    %449 = arith.addf %448, %447 : vector<8x96xf32>
    %450 = arith.divf %448, %449 : vector<8x96xf32>
    %451 = vector.extract_strided_slice %450 {offsets = [0, 0], sizes = [8, 32], strides = [1, 1]} : vector<8x96xf32> to vector<8x32xf32>
    %452 = vector.extract_strided_slice %450 {offsets = [0, 32], sizes = [8, 32], strides = [1, 1]} : vector<8x96xf32> to vector<8x32xf32>
    %453 = vector.extract_strided_slice %450 {offsets = [0, 64], sizes = [8, 32], strides = [1, 1]} : vector<8x96xf32> to vector<8x32xf32>
    %454 = vector.extract_strided_slice %444 {offsets = [0, 96], sizes = [8, 32], strides = [1, 1]} : vector<8x128xf32> to vector<8x32xf32>
    %455 = math.tanh %454 : vector<8x32xf32>
    %456 = arith.mulf %452, %435 : vector<8x32xf32>
    %457 = arith.mulf %451, %455 : vector<8x32xf32>
    %458 = arith.addf %456, %457 : vector<8x32xf32>
    %459 = math.tanh %458 : vector<8x32xf32>
    %460 = arith.mulf %453, %459 : vector<8x32xf32>
    %461 = arith.addf %438, %460 : vector<8x32xf32>
    %c8_i32_165 = arith.constant 8 : i32
    %c0_166 = arith.constant 0 : index
    %c0_167 = arith.constant 0 : index
    %462 = vector.load %arg9[%c0_166, %c0_167] : memref<32x4xf32, #tpu.memory_space<vmem>>, vector<32x4xf32>
    %cst_168 = arith.constant dense<0.000000e+00> : vector<8x4xf32>
    %463 = tpu.matmul %461, %462, %cst_168 {dimension_numbers = #tpu.dot_dimension_numbers<[1], [0], [0], [1], [0, 0, 1, 1], [], []>} : vector<8x32xf32>, vector<32x4xf32>, vector<8x4xf32> -> vector<8x4xf32>
    %cst_169 = arith.constant 1.250000e-01 : f32
    %464 = vector.broadcast %cst_169 : f32 to vector<8x4xf32>
    %465 = arith.mulf %463, %464 : vector<8x4xf32>
    %c0_170 = arith.constant 0 : index
    %c0_171 = arith.constant 0 : index
    %466 = vector.load %arg10[%c0_170, %c0_171] : memref<1x4xf32, #tpu.memory_space<vmem>>, vector<1x4xf32>
    %467 = vector.broadcast %466 : vector<1x4xf32> to vector<8x4xf32>
    %468 = arith.addf %465, %467 : vector<8x4xf32>
    %c0_172 = arith.constant 0 : index
    %c0_173 = arith.constant 0 : index
    %469 = vector.load %arg11[%c0_172, %c0_173] : memref<8x4xf32, #tpu.memory_space<vmem>>, vector<8x4xf32>
    tpu.vector_store %arg11[%c0_172, %c0_173], %468 {strides = array<i32>} : memref<8x4xf32, #tpu.memory_space<vmem>>, vector<8x4xf32>,
    return
  }
}

</mosaic_0001>

<bundles_post_ra>
// kernel: glove_classifier_forward.1
= control target key start
LH: loop header
LB: loop body
LE: loop exit
PB: predicated region body
PF: predicated region fallthrough
CT: control target
= control target key end

     0   :  { %vm51_vm0 = vcmask 261120   ;;  %v1675_v15 = vmov 0.0   ;;  %s2113_s1 = inlined_call_operand.vmem [shape: f32[32,128], index: 1, kind: input, shape index: {}]   ;;  %s2114_s2 = inlined_call_operand.vmem [shape: f32[32,128], index: 2, kind: input, shape index: {}]   ;;  %s2115_s0 = inlined_call_operand.vmem [shape: f32[64,32], index: 0, kind: input, shape index: {}]   ;;  %s2116_s3 = inlined_call_operand.vmem [shape: f32[1,128], index: 3, kind: input, shape index: {}]   ;;  %s2117_s4 = inlined_call_operand.vmem [shape: f32[32,128], index: 4, kind: input, shape index: {}]   ;;  %s2118_s5 = inlined_call_operand.vmem [shape: f32[32,128], index: 5, kind: input, shape index: {}]   ;;  %s2119_s7 = inlined_call_operand.vmem [shape: f32[1,128], index: 7, kind: input, shape index: {}]   ;;  %s2120_s6 = inlined_call_operand.vmem [shape: f32[32,128], index: 6, kind: input, shape index: {}]   ;;  %s2121_s8 = inlined_call_operand.vmem [shape: f32[32,128], index: 8, kind: input, shape index: {}]   ;;  %s2122_s9 = inlined_call_operand.vmem [shape: f32[32,4], index: 9, kind: input, shape index: {}]   ;;  %s2123_s10 = inlined_call_operand.vmem [shape: f32[1,4], index: 10, kind: input, shape index: {}]   ;;  %s2124_s11 = inlined_call_operand.vmem [shape: f32[8,4], index: 11, kind: output, shape index: {}]  }
   0x1   :  { %v50_v0 = vld [vmem:[%s2113_s1 + $0x18] sm:$0xff]  ;;  %v49_v2 = vld [vmem:[%s2113_s1 + $0x10] sm:$0xff]  ;;  %v48_v4 = vld [vmem:[%s2113_s1 + $0x8] sm:$0xff] }
   0x2   :  { %v139_v1 = vld [vmem:[%s2114_s2 + $0x18] sm:$0xff]  ;;  %88 = vmatpush.msra.mxu0 %v50_v0  ;;  %v138_v3 = vld [vmem:[%s2114_s2 + $0x10] sm:$0xff]  ;;  %v137_v5 = vld [vmem:[%s2114_s2 + $0x8] sm:$0xff] }
   0x3   :  { %152 = vmatpush.msra.mxu1 %v139_v1  ;;  %v47_v6 = vld [vmem:[%s2113_s1] sm:$0xff]  ;;  %v39_v9 = vld [vmem:[%s2115_s0 + $0x8] sm:$0xff]  ;;  %v1775_v10 = vld [vmem:[%s2117_s4 + $0x18] sm:$0xff] }
   0x4   :  { %89 = vmatpush.msra.mxu0 %v49_v2  ;;  %v136_v7 = vld [vmem:[%s2114_s2] sm:$0xff]  ;;  %v1780_v11 = vld [vmem:[%s2117_s4 + $0x10] sm:$0xff]  ;;  %225 = vmatpush.msra.mxu2 %v1775_v10  ;;  %v1794_v13 = vld [vmem:[%s2117_s4 + $0x8] sm:$0xff] }
   0x5   :  { %153 = vmatpush.msra.mxu1 %v138_v3  ;;  %v38_v8 = vld [vmem:[%s2115_s0] sm:$0xff]  ;;  %292 = vmatpush.msra.mxu3 %v1775_v10  ;;  %v40_v12 = vld [vmem:[%s2115_s0 + $0x10] sm:$0xff]  ;;  %v41_v16 = vld [vmem:[%s2115_s0 + $0x18] sm:$0xff] }
   0x6   :  { %90 = vmatpush.msra.mxu0 %v48_v4  ;;  %226 = vmatpush.msra.mxu2 %v1780_v11  ;;  %v1799_v14 = vld [vmem:[%s2117_s4] sm:$0xff]  ;;  %v43_v18 = vld [vmem:[%s2115_s0 + $0x28] sm:$0xff]  ;;  %v44_v19 = vld [vmem:[%s2115_s0 + $0x30] sm:$0xff] }
   0x7   :  { %154 = vmatpush.msra.mxu1 %v137_v5  ;;  %293 = vmatpush.msra.mxu3 %v1780_v11  ;;  %v42_v17 = vld [vmem:[%s2115_s0 + $0x20] sm:$0xff]  ;;  %v45_v20 = vld [vmem:[%s2115_s0 + $0x38] sm:$0xff]  ;;  %s1676_s0 = smov 32  }
   0x8   :  { %91 = vmatpush.msra.mxu0 %v47_v6  ;;  %227 = vmatpush.msra.mxu2 %v1794_v13  ;;  %v1544_v29 = vld [vmem:[%s2116_s3] ss:$0 sm:$0xff]  ;;  %s1677_s3 = smov 64  }
   0x9   :  { %155 = vmatpush.msra.mxu1 %v136_v7  ;;  %1478 = vmatmul.msk.f32.vlgmr.msra.gmra.mxu0 %vm51_vm0, %v38_v8 }
   0xa   :  { %1486 = vmatmul.msk.f32.vlgmr.msra.gmra.mxu1 %vm51_vm0, %v38_v8  ;;  %294 = vmatpush.msra.mxu3 %v1794_v13 }
   0xb   :  { %228 = vmatpush.msra.mxu2 %v1799_v14 }
   0xc   :  { %295 = vmatpush.msra.mxu3 %v1799_v14  ;;  %229 = vmatmul.f32.vlgmr.msra.gmra.mxu2 %v1675_v15 }
   0xd   :  { %360 = vmatpush.msrb.mxu2 %v1775_v10 }
   0xe   :  { %428 = vmatpush.msrb.mxu3 %v1775_v10 }
   0xf   :  { %361 = vmatpush.msrb.mxu2 %v1780_v11 }
  0x10   :  { %429 = vmatpush.msrb.mxu3 %v1780_v11 }
  0x11   :  { %1479 = vmatmul.msk.f32.gmra.mxu0 %vm51_vm0, %v39_v9  ;;  %362 = vmatpush.msrb.mxu2 %v1794_v13 }
  0x12   :  { %1487 = vmatmul.msk.f32.gmra.mxu1 %vm51_vm0, %v39_v9  ;;  %430 = vmatpush.msrb.mxu3 %v1794_v13 }
  0x13   :  { %363 = vmatpush.msrb.mxu2 %v1799_v14 }
  0x14   :  { %431 = vmatpush.msrb.mxu3 %v1799_v14 }
  0x15   :  { %496 = vmatpush.msra.mxu2 %v1775_v10 }
  0x17   :  { %497 = vmatpush.msra.mxu2 %v1780_v11 }
  0x19   :  { %1480 = vmatmul.msk.f32.gmra.mxu0 %vm51_vm0, %v40_v12  ;;  %498 = vmatpush.msra.mxu2 %v1794_v13 }
  0x1a   :  { %1488 = vmatmul.msk.f32.gmra.mxu1 %vm51_vm0, %v40_v12 }
  0x1b   :  { %499 = vmatpush.msra.mxu2 %v1799_v14 }
  0x21   :  { %1481 = vmatmul.msk.f32.gmra.mxu0 %vm51_vm0, %v41_v16 }
  0x22   :  { %1489 = vmatmul.msk.f32.gmra.mxu1 %vm51_vm0, %v41_v16 }
  0x29   :  { %1482 = vmatmul.msk.f32.gmra.mxu0 %vm51_vm0, %v42_v17 }
  0x2a   :  { %1490 = vmatmul.msk.f32.gmra.mxu1 %vm51_vm0, %v42_v17 }
  0x31   :  { %1483 = vmatmul.msk.f32.gmra.mxu0 %vm51_vm0, %v43_v18 }
  0x32   :  { %1491 = vmatmul.msk.f32.gmra.mxu1 %vm51_vm0, %v43_v18 }
  0x39   :  { %1484 = vmatmul.msk.f32.gmra.mxu0 %vm51_vm0, %v44_v19 }
  0x3a   :  { %1492 = vmatmul.msk.f32.gmra.mxu1 %vm51_vm0, %v44_v19 }
  0x41   :  { %1485 = vmatmul.msk.f32.gmra.mxu0 %vm51_vm0, %v45_v20 }
  0x42   :  { %1493 = vmatmul.msk.f32.gmra.mxu1 %vm51_vm0, %v45_v20 }
  0x86   :  { %v93_v21 = vpop.f32.mrf.mxu0 }
  0x87   :  { %v157_v22 = vpop.f32.mrf.mxu1  ;;  %v120_v48 = vadd.f32 %v1544_v29, %v93_v21 }
  0x8e   :  { %v96_v23 = vpop.f32.mrf.mxu0 }
  0x8f   :  { %v160_v24 = vpop.f32.mrf.mxu1  ;;  %v121_v42 = vadd.f32 %v1544_v29, %v96_v23  ;;  %v230_v49 = vpop.f32.mrf.mxu2 }
  0x96   :  { %v99_v25 = vpop.f32.mrf.mxu0 }
  0x97   :  { %v163_v26 = vpop.f32.mrf.mxu1  ;;  %v122_v36 = vadd.f32 %v1544_v29, %v99_v25 }
  0x9e   :  { %v102_v27 = vpop.f32.mrf.mxu0 }
  0x9f   :  { %v166_v28 = vpop.f32.mrf.mxu1  ;;  %v123_v30 = vadd.f32 %v1544_v29, %v102_v27 }
  0xa6   :  { %v105_v31 = vpop.f32.mrf.mxu0 }
  0xa7   :  { %v169_v32 = vpop.f32.mrf.mxu1  ;;  %v124_v33 = vadd.f32 %v1544_v29, %v105_v31 }
  0xa8   :  { %v1846_v34 = vadd.f32 %v169_v32, %v123_v30 }
  0xa9   :  { %v1848_v35 = vadd.f32 %v166_v28, %v124_v33 }
  0xae   :  { %v108_v37 = vpop.f32.mrf.mxu0 }
  0xaf   :  { %v172_v38 = vpop.f32.mrf.mxu1  ;;  %v125_v39 = vadd.f32 %v1544_v29, %v108_v37 }
  0xb0   :  { %v1850_v40 = vadd.f32 %v172_v38, %v122_v36 }
  0xb1   :  { %v1852_v41 = vadd.f32 %v163_v26, %v125_v39 }
  0xb6   :  { %v111_v43 = vpop.f32.mrf.mxu0 }
  0xb7   :  { %v175_v44 = vpop.f32.mrf.mxu1  ;;  %v126_v45 = vadd.f32 %v1544_v29, %v111_v43 }
  0xb8   :  { %v185_v46 = vadd.f32 %v175_v44, %v121_v42 }
  0xb9   :  { %v1854_v47 = vadd.f32 %v160_v24, %v126_v45 }
  0xbe   :  { %v114_v50 = vpop.f32.mrf.mxu0 }
  0xbf   :  { %v178_v51 = vpop.f32.mrf.mxu1  ;;  %v127_v52 = vadd.f32 %v1544_v29, %v114_v50 }
  0xc0   :  { %v182_v53 = vadd.f32 %v178_v51, %v120_v48 }
  0xc1   :  { %v1856_v55 = vadd.f32 %v157_v22, %v127_v52 }
  0xc2   :  { %v233_v54 = vadd.f32 %v230_v49, %v182_v53 }
  0xc4   :  { %1547 = vtanh.f32 %v233_v54  ;;  %v1494_v57 = vmul.f32 -1.442695, %v233_v54 }
  0xc6   :  { %1549 = vpow2.f32 %v1494_v57 }
  0xca   :  { %v1548_v56 = vpop.eup %1547 }
  0xcb   :  { %256 = vrot.lane.b32.xlu0 %v1548_v56, %s1676_s0 }
  0xcc   :  { %v1550_v58 = vpop.eup %1549 }
  0xcd   :  { %v237_v59 = vadd.f32 1.0, %v1550_v58 }
  0xcf   :  { %1551 = vrcp.f32 %v237_v59  ;;  %v249_v1 = vand.u32 2147483648, %v237_v59  ;;  %vm243_vm2 = vweird.f32 %v237_v59  ;;  %v247_v2 = vand.u32 2147483647, %v237_v59 }
  0xd1   :  { %v250_v4 = vor.u32 1.1754944e-38, %v249_v1  ;;  %vm248_vm4 = vcmp.eq.f32.partialorder %v247_v2, 8.507059e+37 }
  0xd5   :  { %v1552_v60 = vpop.eup %1551 }
  0xd6   :  { %v239_v61 = vmul.f32 %v1552_v60, %v237_v59  ;;  %vm244_vm1 = vweird.f32 %v1552_v60 }
  0xd7   :  { %vm245_vm3 = vmor %vm243_vm2, %vm244_vm1 }
  0xd8   :  { %v240_v62 = vsub.f32 1.0, %v239_v61 }
  0xda   :  { %v241_v63 = vmul.f32 %v1552_v60, %v240_v62 }
  0xdc   :  { %v242_v0 = vadd.f32 %v1552_v60, %v241_v63 }
  0xde   :  { %v246_v3 = vsel %vm245_vm3, %v1552_v60, %v242_v0 }
  0xdf   :  { %v251_v6 = vsel %vm248_vm4, %v250_v4, %v246_v3 }
  0xe0   :  { %v254_v8 = vmul.f32 0.0, %v251_v6 }
 0x13d   :  { %v257_v5 = vpop.permute.xlu0 %256 }
 0x13e   :  { %v259_v7 = vmul.f32 %v257_v5, %v251_v6 }
 0x140   :  { %261 = vrot.lane.b32.xlu0 %v259_v7, %s1676_s0 }
 0x1b2   :  { %v262_v9 = vpop.permute.xlu0 %261 }
 0x1b3   :  { %v264_v12 = vadd.f32 %v262_v9, %v254_v8 }
 0x1b5   :  { %1553 = vtanh.f32 %v264_v12 }
 0x1bb   :  { %v1554_v16 = vpop.eup %1553 }
 0x1bc   :  { %267 = vrot.lane.b32.xlu1 %v1554_v16, %s1676_s0 }
 0x22e   :  { %v268_v17 = vpop.permute.xlu1 %267 }
 0x22f   :  { %v270_v18 = vmul.f32 %v268_v17, %v251_v6 }
 0x231   :  { %272 = vrot.lane.b32.xlu1 %v270_v18, %s1677_s3 }
 0x2a3   :  { %v273_v19 = vpop.permute.xlu1 %272 }
 0x2a4   :  { %275 = vst.msk [vmem:[#allocation3] sm:$0xff] %vm51_vm0, %v273_v19  ;;  %1495 = vmatmul.msk.f32.vlgmr.msra.gmra.mxu3 %vm51_vm0, %v273_v19 }
 0x2a5   :  { %564 = vmatpush.msra.mxu3 %v1775_v10 }
 0x2a7   :  { %565 = vmatpush.msra.mxu3 %v1780_v11 }
 0x2a9   :  { %566 = vmatpush.msra.mxu3 %v1794_v13 }
 0x2ab   :  { %567 = vmatpush.msra.mxu3 %v1799_v14 }
 0x327   :  { %v297_v20 = vpop.f32.mrf.mxu3 }
 0x328   :  { %v300_v21 = vadd.f32 %v297_v20, %v185_v46 }
 0x32a   :  { %1555 = vtanh.f32 %v300_v21  ;;  %v1496_v23 = vmul.f32 -1.442695, %v300_v21 }
 0x32c   :  { %1557 = vpow2.f32 %v1496_v23 }
 0x330   :  { %v1556_v22 = vpop.eup %1555 }
 0x331   :  { %323 = vrot.lane.b32.xlu2 %v1556_v22, %s1676_s0 }
 0x332   :  { %v1558_v24 = vpop.eup %1557 }
 0x333   :  { %v304_v25 = vadd.f32 1.0, %v1558_v24 }
 0x335   :  { %1559 = vrcp.f32 %v304_v25  ;;  %v316_v31 = vand.u32 2147483648, %v304_v25  ;;  %vm310_vm6 = vweird.f32 %v304_v25  ;;  %v314_v32 = vand.u32 2147483647, %v304_v25 }
 0x337   :  { %v317_v36 = vor.u32 1.1754944e-38, %v316_v31  ;;  %vm315_vm8 = vcmp.eq.f32.partialorder %v314_v32, 8.507059e+37 }
 0x33b   :  { %v1560_v26 = vpop.eup %1559 }
 0x33c   :  { %v306_v27 = vmul.f32 %v1560_v26, %v304_v25  ;;  %vm311_vm5 = vweird.f32 %v1560_v26 }
 0x33d   :  { %vm312_vm7 = vmor %vm310_vm6, %vm311_vm5 }
 0x33e   :  { %v307_v28 = vsub.f32 1.0, %v306_v27 }
 0x340   :  { %v308_v29 = vmul.f32 %v1560_v26, %v307_v28 }
 0x342   :  { %v309_v30 = vadd.f32 %v1560_v26, %v308_v29 }
 0x344   :  { %v313_v33 = vsel %vm312_vm7, %v1560_v26, %v309_v30 }
 0x345   :  { %v318_v38 = vsel %vm315_vm8, %v317_v36, %v313_v33 }
 0x346   :  { %v321_v42 = vmul.f32 %v318_v38, %v264_v12 }
 0x38b   :  { %v324_v37 = vpop.permute.xlu2 %323 }
 0x38c   :  { %v326_v39 = vmul.f32 %v324_v37, %v318_v38 }
 0x38e   :  { %328 = vrot.lane.b32.xlu2 %v326_v39, %s1676_s0 }
 0x3e8   :  { %v329_v43 = vpop.permute.xlu2 %328 }
 0x3e9   :  { %v331_v44 = vadd.f32 %v329_v43, %v321_v42 }
 0x3eb   :  { %1561 = vtanh.f32 %v331_v44 }
 0x3f1   :  { %v1562_v45 = vpop.eup %1561 }
 0x3f2   :  { %334 = vrot.lane.b32.xlu0 %v1562_v45, %s1676_s0 }
 0x464   :  { %v335_v46 = vpop.permute.xlu0 %334 }
 0x465   :  { %v337_v48 = vmul.f32 %v335_v46, %v318_v38 }
 0x467   :  { %339 = vrot.lane.b32.xlu1 %v337_v48, %s1677_s3 }
 0x4d9   :  { %v340_v49 = vpop.permute.xlu1 %339 }
 0x4da   :  { %343 = vst.msk [vmem:[#allocation3 + $0x8] sm:$0xff] %vm51_vm0, %v340_v49  ;;  %1497 = vmatmul.msk.f32.vlgmr.msrb.gmra.mxu2 %vm51_vm0, %v340_v49 }
 0x4db   :  { %632 = vmatpush.msrb.mxu2 %v1775_v10 }
 0x4dd   :  { %633 = vmatpush.msrb.mxu2 %v1780_v11 }
 0x4df   :  { %634 = vmatpush.msrb.mxu2 %v1794_v13 }
 0x4e1   :  { %635 = vmatpush.msrb.mxu2 %v1799_v14 }
 0x55d   :  { %v365_v50 = vpop.f32.mrf.mxu2 }
 0x55e   :  { %v368_v51 = vadd.f32 %v365_v50, %v1850_v40 }
 0x560   :  { %1563 = vtanh.f32 %v368_v51  ;;  %v1498_v53 = vmul.f32 -1.442695, %v368_v51 }
 0x562   :  { %1565 = vpow2.f32 %v1498_v53 }
 0x566   :  { %v1564_v52 = vpop.eup %1563 }
 0x567   :  { %391 = vrot.lane.b32.xlu2 %v1564_v52, %s1676_s0 }
 0x568   :  { %v1566_v54 = vpop.eup %1565 }
 0x569   :  { %v372_v56 = vadd.f32 1.0, %v1566_v54 }
 0x56b   :  { %1567 = vrcp.f32 %v372_v56  ;;  %v384_v62 = vand.u32 2147483648, %v372_v56  ;;  %vm378_vm10 = vweird.f32 %v372_v56  ;;  %v382_v63 = vand.u32 2147483647, %v372_v56 }
 0x56d   :  { %v385_v0 = vor.u32 1.1754944e-38, %v384_v62  ;;  %vm383_vm12 = vcmp.eq.f32.partialorder %v382_v63, 8.507059e+37 }
 0x571   :  { %v1568_v57 = vpop.eup %1567 }
 0x572   :  { %v374_v58 = vmul.f32 %v1568_v57, %v372_v56  ;;  %vm379_vm9 = vweird.f32 %v1568_v57 }
 0x573   :  { %vm380_vm11 = vmor %vm378_vm10, %vm379_vm9 }
 0x574   :  { %v375_v59 = vsub.f32 1.0, %v374_v58 }
 0x576   :  { %v376_v60 = vmul.f32 %v1568_v57, %v375_v59 }
 0x578   :  { %v377_v61 = vadd.f32 %v1568_v57, %v376_v60 }
 0x57a   :  { %v381_v40 = vsel %vm380_vm11, %v1568_v57, %v377_v61 }
 0x57b   :  { %v386_v2 = vsel %vm383_vm12, %v385_v0, %v381_v40 }
 0x57c   :  { %v389_v4 = vmul.f32 %v386_v2, %v331_v44 }
 0x5c1   :  { %v392_v1 = vpop.permute.xlu2 %391 }
 0x5c2   :  { %v394_v3 = vmul.f32 %v392_v1, %v386_v2 }
 0x5c4   :  { %396 = vrot.lane.b32.xlu0 %v394_v3, %s1676_s0 }
 0x636   :  { %v397_v5 = vpop.permute.xlu0 %396 }
 0x637   :  { %v399_v6 = vadd.f32 %v397_v5, %v389_v4 }
 0x639   :  { %1569 = vtanh.f32 %v399_v6 }
 0x63f   :  { %v1570_v7 = vpop.eup %1569 }
 0x640   :  { %402 = vrot.lane.b32.xlu1 %v1570_v7, %s1676_s0 }
 0x6b2   :  { %v403_v8 = vpop.permute.xlu1 %402 }
 0x6b3   :  { %v405_v9 = vmul.f32 %v403_v8, %v386_v2 }
 0x6b5   :  { %407 = vrot.lane.b32.xlu2 %v405_v9, %s1677_s3 }
 0x70f   :  { %v408_v12 = vpop.permute.xlu2 %407 }
 0x710   :  { %411 = vst.msk [vmem:[#allocation3 + $0x10] sm:$0xff] %vm51_vm0, %v408_v12  ;;  %1499 = vmatmul.msk.f32.vlgmr.msrb.gmra.mxu3 %vm51_vm0, %v408_v12 }
 0x711   :  { %700 = vmatpush.msrb.mxu3 %v1775_v10 }
 0x713   :  { %701 = vmatpush.msrb.mxu3 %v1780_v11 }
 0x715   :  { %702 = vmatpush.msrb.mxu3 %v1794_v13 }
 0x717   :  { %703 = vmatpush.msrb.mxu3 %v1799_v14 }
 0x793   :  { %v433_v16 = vpop.f32.mrf.mxu3 }
 0x794   :  { %v436_v17 = vadd.f32 %v433_v16, %v1846_v34 }
 0x796   :  { %1571 = vtanh.f32 %v436_v17  ;;  %v1500_v19 = vmul.f32 -1.442695, %v436_v17 }
 0x798   :  { %1573 = vpow2.f32 %v1500_v19 }
 0x79c   :  { %v1572_v18 = vpop.eup %1571 }
 0x79d   :  { %459 = vrot.lane.b32.xlu0 %v1572_v18, %s1676_s0 }
 0x79e   :  { %v1574_v20 = vpop.eup %1573 }
 0x79f   :  { %v440_v21 = vadd.f32 1.0, %v1574_v20 }
 0x7a1   :  { %1575 = vrcp.f32 %v440_v21  ;;  %v452_v13 = vand.u32 2147483648, %v440_v21  ;;  %vm446_vm14 = vweird.f32 %v440_v21  ;;  %v450_v14 = vand.u32 2147483647, %v440_v21 }
 0x7a3   :  { %v453_v25 = vor.u32 1.1754944e-38, %v452_v13  ;;  %vm451_vm1 = vcmp.eq.f32.partialorder %v450_v14, 8.507059e+37 }
 0x7a7   :  { %v1576_v22 = vpop.eup %1575 }
 0x7a8   :  { %v442_v10 = vmul.f32 %v1576_v22, %v440_v21  ;;  %vm447_vm13 = vweird.f32 %v1576_v22 }
 0x7a9   :  { %vm448_vm15 = vmor %vm446_vm14, %vm447_vm13 }
 0x7aa   :  { %v443_v23 = vsub.f32 1.0, %v442_v10 }
 0x7ac   :  { %v444_v11 = vmul.f32 %v1576_v22, %v443_v23 }
 0x7ae   :  { %v445_v24 = vadd.f32 %v1576_v22, %v444_v11 }
 0x7b0   :  { %v449_v34 = vsel %vm448_vm15, %v1576_v22, %v445_v24 }
 0x7b1   :  { %v454_v27 = vsel %vm451_vm1, %v453_v25, %v449_v34  ;;  %v764_v34 = vld [vmem:[%s2118_s5 + $0x18] sm:$0xff]  ;;  %v763_v25 = vld [vmem:[%s2118_s5 + $0x10] sm:$0xff] }
 0x7b2   :  { %v457_v29 = vmul.f32 %v454_v27, %v399_v6 }
 0x80f   :  { %v460_v26 = vpop.permute.xlu0 %459 }
 0x810   :  { %v462_v28 = vmul.f32 %v460_v26, %v454_v27  ;;  %v762_v26 = vld [vmem:[%s2118_s5 + $0x8] sm:$0xff] }
 0x812   :  { %464 = vrot.lane.b32.xlu1 %v462_v28, %s1676_s0 }
 0x884   :  { %v465_v30 = vpop.permute.xlu1 %464 }
 0x885   :  { %v467_v31 = vadd.f32 %v465_v30, %v457_v29  ;;  %v1922_v29 = vld [vmem:[#allocation3] sm:$0xff]  ;;  %v753_v30 = vld [vmem:[#allocation3 + $0x8] sm:$0xff] }
 0x887   :  { %1577 = vtanh.f32 %v467_v31 }
 0x88d   :  { %v1578_v32 = vpop.eup %1577 }
 0x88e   :  { %470 = vrot.lane.b32.xlu2 %v1578_v32, %s1676_s0 }
 0x8e8   :  { %v471_v33 = vpop.permute.xlu2 %470 }
 0x8e9   :  { %v473_v36 = vmul.f32 %v471_v33, %v454_v27  ;;  %v761_v27 = vld [vmem:[%s2118_s5] sm:$0xff] }
 0x8eb   :  { %475 = vrot.lane.b32.xlu0 %v473_v36, %s1677_s3 }
 0x95d   :  { %v476_v37 = vpop.permute.xlu0 %475 }
 0x95e   :  { %479 = vst.msk [vmem:[#allocation3 + $0x18] sm:$0xff] %vm51_vm0, %v476_v37  ;;  %1501 = vmatmul.msk.f32.vlgmr.msra.gmra.mxu2 %vm51_vm0, %v476_v37 }
 0x95f   :  { %801 = vmatpush.msra.mxu2 %v764_v34  ;;  %v1966_v34 = vld [vmem:[%s2121_s8 + $0x18] sm:$0xff] }
 0x960   :  { %935 = vmatpush.msrb.mxu0 %v1966_v34  ;;  %1000 = vmatpush.msrb.mxu1 %v1966_v34 }
 0x961   :  { %802 = vmatpush.msra.mxu2 %v763_v25  ;;  %v1971_v25 = vld [vmem:[%s2121_s8 + $0x10] sm:$0xff] }
 0x962   :  { %936 = vmatpush.msrb.mxu0 %v1971_v25  ;;  %1001 = vmatpush.msrb.mxu1 %v1971_v25 }
 0x963   :  { %803 = vmatpush.msra.mxu2 %v762_v26  ;;  %v1978_v26 = vld [vmem:[%s2121_s8 + $0x8] sm:$0xff] }
 0x964   :  { %937 = vmatpush.msrb.mxu0 %v1978_v26  ;;  %1002 = vmatpush.msrb.mxu1 %v1978_v26 }
 0x965   :  { %804 = vmatpush.msra.mxu2 %v761_v27  ;;  %v755_v32 = vld [vmem:[#allocation3 + $0x18] sm:$0xff] }
 0x9e1   :  { %v501_v38 = vpop.f32.mrf.mxu2 }
 0x9e2   :  { %v504_v39 = vadd.f32 %v501_v38, %v1848_v35 }
 0x9e4   :  { %1579 = vtanh.f32 %v504_v39  ;;  %v1502_v43 = vmul.f32 -1.442695, %v504_v39 }
 0x9e6   :  { %1581 = vpow2.f32 %v1502_v43 }
 0x9ea   :  { %v1580_v42 = vpop.eup %1579 }
 0x9eb   :  { %527 = vrot.lane.b32.xlu1 %v1580_v42, %s1676_s0 }
 0x9ec   :  { %v1582_v44 = vpop.eup %1581 }
 0x9ed   :  { %v508_v45 = vadd.f32 1.0, %v1582_v44 }
 0x9ef   :  { %1583 = vrcp.f32 %v508_v45  ;;  %v520_v52 = vand.u32 2147483648, %v508_v45  ;;  %vm514_vm3 = vweird.f32 %v508_v45  ;;  %v518_v53 = vand.u32 2147483647, %v508_v45 }
 0x9f1   :  { %v521_v54 = vor.u32 1.1754944e-38, %v520_v52  ;;  %vm519_vm5 = vcmp.eq.f32.partialorder %v518_v53, 8.507059e+37 }
 0x9f5   :  { %v1584_v46 = vpop.eup %1583 }
 0x9f6   :  { %v510_v48 = vmul.f32 %v1584_v46, %v508_v45  ;;  %vm515_vm2 = vweird.f32 %v1584_v46 }
 0x9f7   :  { %vm516_vm4 = vmor %vm514_vm3, %vm515_vm2 }
 0x9f8   :  { %v511_v49 = vsub.f32 1.0, %v510_v48 }
 0x9fa   :  { %v512_v50 = vmul.f32 %v1584_v46, %v511_v49 }
 0x9fc   :  { %v513_v51 = vadd.f32 %v1584_v46, %v512_v50 }
 0x9fe   :  { %v517_v35 = vsel %vm516_vm4, %v1584_v46, %v513_v51 }
 0x9ff   :  { %v522_v57 = vsel %vm519_vm5, %v521_v54, %v517_v35 }
 0xa00   :  { %v525_v59 = vmul.f32 %v522_v57, %v467_v31  ;;  %v754_v31 = vld [vmem:[#allocation3 + $0x10] sm:$0xff] }
 0xa5d   :  { %v528_v56 = vpop.permute.xlu1 %527 }
 0xa5e   :  { %v530_v58 = vmul.f32 %v528_v56, %v522_v57 }
 0xa60   :  { %532 = vrot.lane.b32.xlu2 %v530_v58, %s1676_s0 }
 0xaba   :  { %v533_v60 = vpop.permute.xlu2 %532 }
 0xabb   :  { %v535_v61 = vadd.f32 %v533_v60, %v525_v59 }
 0xabd   :  { %1585 = vtanh.f32 %v535_v61 }
 0xac3   :  { %v1586_v62 = vpop.eup %1585 }
 0xac4   :  { %538 = vrot.lane.b32.xlu0 %v1586_v62, %s1676_s0 }
 0xb36   :  { %v539_v63 = vpop.permute.xlu0 %538 }
 0xb37   :  { %v541_v40 = vmul.f32 %v539_v63, %v522_v57  ;;  %v852_v63 = vld [vmem:[%s2120_s6 + $0x18] sm:$0xff] }
 0xb39   :  { %543 = vrot.lane.b32.xlu1 %v541_v40, %s1677_s3  ;;  %v851_v40 = vld [vmem:[%s2120_s6 + $0x10] sm:$0xff] }
 0xbab   :  { %v544_v0 = vpop.permute.xlu1 %543 }
 0xbac   :  { %547 = vst.msk [vmem:[#allocation3 + $0x20] sm:$0xff] %vm51_vm0, %v544_v0  ;;  %1503 = vmatmul.msk.f32.vlgmr.msra.gmra.mxu3 %vm51_vm0, %v544_v0  ;;  %v850_v0 = vld [vmem:[%s2120_s6 + $0x8] sm:$0xff] }
 0xbad   :  { %865 = vmatpush.msra.mxu3 %v852_v63 }
 0xbaf   :  { %866 = vmatpush.msra.mxu3 %v851_v40 }
 0xbb1   :  { %867 = vmatpush.msra.mxu3 %v850_v0 }
 0xbb3   :  { %v756_v33 = vld [vmem:[#allocation3 + $0x20] sm:$0xff] }
 0xc2f   :  { %v569_v1 = vpop.f32.mrf.mxu3 }
 0xc30   :  { %v572_v2 = vadd.f32 %v569_v1, %v1852_v41  ;;  %v849_v1 = vld [vmem:[%s2120_s6] sm:$0xff] }
 0xc31   :  { %868 = vmatpush.msra.mxu3 %v849_v1 }
 0xc32   :  { %1587 = vtanh.f32 %v572_v2  ;;  %v1504_v4 = vmul.f32 -1.442695, %v572_v2 }
 0xc34   :  { %1589 = vpow2.f32 %v1504_v4 }
 0xc38   :  { %v1588_v3 = vpop.eup %1587 }
 0xc39   :  { %595 = vrot.lane.b32.xlu2 %v1588_v3, %s1676_s0 }
 0xc3a   :  { %v1590_v5 = vpop.eup %1589 }
 0xc3b   :  { %v576_v6 = vadd.f32 1.0, %v1590_v5 }
 0xc3d   :  { %1591 = vrcp.f32 %v576_v6  ;;  %v588_v17 = vand.u32 2147483648, %v576_v6  ;;  %vm582_vm7 = vweird.f32 %v576_v6  ;;  %v586_v18 = vand.u32 2147483647, %v576_v6 }
 0xc3f   :  { %v589_v19 = vor.u32 1.1754944e-38, %v588_v17  ;;  %vm587_vm9 = vcmp.eq.f32.partialorder %v586_v18, 8.507059e+37 }
 0xc43   :  { %v1592_v7 = vpop.eup %1591 }
 0xc44   :  { %v578_v8 = vmul.f32 %v1592_v7, %v576_v6  ;;  %vm583_vm6 = vweird.f32 %v1592_v7 }
 0xc45   :  { %vm584_vm8 = vmor %vm582_vm7, %vm583_vm6 }
 0xc46   :  { %v579_v9 = vsub.f32 1.0, %v578_v8 }
 0xc48   :  { %v580_v12 = vmul.f32 %v1592_v7, %v579_v9 }
 0xc4a   :  { %v581_v16 = vadd.f32 %v1592_v7, %v580_v12 }
 0xc4c   :  { %v585_v41 = vsel %vm584_vm8, %v1592_v7, %v581_v16 }
 0xc4d   :  { %v590_v21 = vsel %vm587_vm9, %v589_v19, %v585_v41 }
 0xc4e   :  { %v593_v10 = vmul.f32 %v590_v21, %v535_v61 }
 0xc93   :  { %v596_v20 = vpop.permute.xlu2 %595 }
 0xc94   :  { %v598_v22 = vmul.f32 %v596_v20, %v590_v21 }
 0xc96   :  { %600 = vrot.lane.b32.xlu0 %v598_v22, %s1676_s0 }
 0xd08   :  { %v601_v23 = vpop.permute.xlu0 %600 }
 0xd09   :  { %v603_v11 = vadd.f32 %v601_v23, %v593_v10 }
 0xd0b   :  { %1593 = vtanh.f32 %v603_v11 }
 0xd11   :  { %v1594_v24 = vpop.eup %1593 }
 0xd12   :  { %606 = vrot.lane.b32.xlu1 %v1594_v24, %s1676_s0 }
 0xd84   :  { %v607_v13 = vpop.permute.xlu1 %606 }
 0xd85   :  { %v609_v14 = vmul.f32 %v607_v13, %v590_v21 }
 0xd87   :  { %611 = vrot.lane.b32.xlu2 %v609_v14, %s1677_s3 }
 0xde1   :  { %v612_v28 = vpop.permute.xlu2 %611 }
 0xde2   :  { %615 = vst.msk [vmem:[#allocation3 + $0x28] sm:$0xff] %vm51_vm0, %v612_v28  ;;  %1505 = vmatmul.msk.f32.vlgmr.msrb.gmra.mxu2 %vm51_vm0, %v612_v28 }
 0xde9   :  { %v757_v36 = vld [vmem:[#allocation3 + $0x28] sm:$0xff] }
 0xdea   :  { %1509 = vmatmul.msk.f32.vlgmr.msra.gmra.mxu2 %vm51_vm0, %v1922_v29 }
 0xdf2   :  { %1510 = vmatmul.msk.f32.gmra.mxu2 %vm51_vm0, %v753_v30 }
 0xdfa   :  { %1511 = vmatmul.msk.f32.gmra.mxu2 %vm51_vm0, %v754_v31 }
 0xe02   :  { %1512 = vmatmul.msk.f32.gmra.mxu2 %vm51_vm0, %v755_v32 }
 0xe0a   :  { %1513 = vmatmul.msk.f32.gmra.mxu2 %vm51_vm0, %v756_v33 }
 0xe12   :  { %1514 = vmatmul.msk.f32.gmra.mxu2 %vm51_vm0, %v757_v36 }
 0xe65   :  { %v637_v37 = vpop.f32.mrf.mxu2 }
 0xe66   :  { %v640_v38 = vadd.f32 %v637_v37, %v1854_v47 }
 0xe68   :  { %1595 = vtanh.f32 %v640_v38  ;;  %v1506_v42 = vmul.f32 -1.442695, %v640_v38 }
 0xe6a   :  { %1597 = vpow2.f32 %v1506_v42  ;;  %v2023_v42 = vld [vmem:[%s2119_s7] ss:$0 sm:$0xff] }
 0xe6e   :  { %v1596_v39 = vpop.eup %1595 }
 0xe6f   :  { %663 = vrot.lane.b32.xlu0 %v1596_v39, %s1676_s0 }
 0xe70   :  { %v1598_v43 = vpop.eup %1597 }
 0xe71   :  { %v644_v44 = vadd.f32 1.0, %v1598_v43  ;;  %v806_v43 = vpop.f32.mrf.mxu2 }
 0xe73   :  { %1599 = vrcp.f32 %v644_v44  ;;  %v656_v51 = vand.u32 2147483648, %v644_v44  ;;  %vm650_vm11 = vweird.f32 %v644_v44  ;;  %v654_v52 = vand.u32 2147483647, %v644_v44 }
 0xe75   :  { %v657_v53 = vor.u32 1.1754944e-38, %v656_v51  ;;  %vm655_vm13 = vcmp.eq.f32.partialorder %v654_v52, 8.507059e+37 }
 0xe79   :  { %v1600_v45 = vpop.eup %1599 }
 0xe7a   :  { %v646_v46 = vmul.f32 %v1600_v45, %v644_v44  ;;  %vm651_vm10 = vweird.f32 %v1600_v45  ;;  %v833_v44 = vadd.f32 %v2023_v42, %v806_v43 }
 0xe7b   :  { %vm652_vm12 = vmor %vm650_vm11, %vm651_vm10 }
 0xe7c   :  { %v647_v48 = vsub.f32 1.0, %v646_v46 }
 0xe7e   :  { %v648_v49 = vmul.f32 %v1600_v45, %v647_v48 }
 0xe80   :  { %v649_v50 = vadd.f32 %v1600_v45, %v648_v49 }
 0xe82   :  { %v653_v47 = vsel %vm652_vm12, %v1600_v45, %v649_v50 }
 0xe83   :  { %v658_v54 = vsel %vm655_vm13, %v657_v53, %v653_v47 }
 0xe84   :  { %v661_v57 = vmul.f32 %v658_v54, %v603_v11 }
 0xee1   :  { %v664_v35 = vpop.permute.xlu0 %663 }
 0xee2   :  { %v666_v56 = vmul.f32 %v664_v35, %v658_v54 }
 0xee4   :  { %668 = vrot.lane.b32.xlu1 %v666_v56, %s1676_s0 }
 0xf56   :  { %v669_v58 = vpop.permute.xlu1 %668 }
 0xf57   :  { %v671_v59 = vadd.f32 %v669_v58, %v661_v57 }
 0xf59   :  { %1601 = vtanh.f32 %v671_v59 }
 0xf5f   :  { %v1602_v60 = vpop.eup %1601 }
 0xf60   :  { %674 = vrot.lane.b32.xlu2 %v1602_v60, %s1676_s0 }
 0xfba   :  { %v675_v61 = vpop.permute.xlu2 %674 }
 0xfbb   :  { %v677_v62 = vmul.f32 %v675_v61, %v658_v54 }
 0xfbd   :  { %679 = vrot.lane.b32.xlu0 %v677_v62, %s1677_s3 }
0x102f   :  { %v680_v2 = vpop.permute.xlu0 %679 }
0x1030   :  { %683 = vst.msk [vmem:[#allocation3 + $0x30] sm:$0xff] %vm51_vm0, %v680_v2  ;;  %1507 = vmatmul.msk.f32.vlgmr.msrb.gmra.mxu3 %vm51_vm0, %v680_v2 }
0x1037   :  { %v758_v3 = vld [vmem:[#allocation3 + $0x30] sm:$0xff] }
0x1038   :  { %1515 = vmatmul.msk.f32.gmra.mxu2 %vm51_vm0, %v758_v3  ;;  %1517 = vmatmul.msk.f32.vlgmr.msra.gmra.mxu3 %vm51_vm0, %v1922_v29  ;;  %v1988_v29 = vld [vmem:[%s2121_s8] sm:$0xff] }
0x1039   :  { %938 = vmatpush.msrb.mxu0 %v1988_v29  ;;  %1003 = vmatpush.msrb.mxu1 %v1988_v29 }
0x103a   :  { %939 = vmatmul.f32.vlgmr.msrb.gmra.mxu0 %v1675_v15 }
0x103b   :  { %1130 = vmatpush.msra.mxu1 %v1966_v34  ;;  %1065 = vmatpush.msra.mxu0 %v1966_v34 }
0x103d   :  { %1131 = vmatpush.msra.mxu1 %v1971_v25  ;;  %1066 = vmatpush.msra.mxu0 %v1971_v25 }
0x103f   :  { %1132 = vmatpush.msra.mxu1 %v1978_v26  ;;  %1067 = vmatpush.msra.mxu0 %v1978_v26 }
0x1040   :  { %1518 = vmatmul.msk.f32.gmra.mxu3 %vm51_vm0, %v753_v30 }
0x1041   :  { %1133 = vmatpush.msra.mxu1 %v1988_v29  ;;  %1068 = vmatpush.msra.mxu0 %v1988_v29 }
0x1043   :  { %1195 = vmatpush.msrb.mxu0 %v1966_v34 }
0x1045   :  { %1196 = vmatpush.msrb.mxu0 %v1971_v25 }
0x1047   :  { %1197 = vmatpush.msrb.mxu0 %v1978_v26 }
0x1048   :  { %1519 = vmatmul.msk.f32.gmra.mxu3 %vm51_vm0, %v754_v31 }
0x1049   :  { %1198 = vmatpush.msrb.mxu0 %v1988_v29 }
0x1050   :  { %1520 = vmatmul.msk.f32.gmra.mxu3 %vm51_vm0, %v755_v32 }
0x1058   :  { %1521 = vmatmul.msk.f32.gmra.mxu3 %vm51_vm0, %v756_v33 }
0x1060   :  { %1522 = vmatmul.msk.f32.gmra.mxu3 %vm51_vm0, %v757_v36 }
0x1068   :  { %1523 = vmatmul.msk.f32.gmra.mxu3 %vm51_vm0, %v758_v3 }
0x10b3   :  { %v705_v4 = vpop.f32.mrf.mxu3 }
0x10b4   :  { %v708_v5 = vadd.f32 %v705_v4, %v1856_v55 }
0x10b6   :  { %1603 = vtanh.f32 %v708_v5  ;;  %v1508_v7 = vmul.f32 -1.442695, %v708_v5 }
0x10b7   :  { %v940_v46 = vpop.f32.mrf.mxu0 }
0x10b8   :  { %1605 = vpow2.f32 %v1508_v7  ;;  %v809_v7 = vpop.f32.mrf.mxu2 }
0x10bb   :  { %v2008_v31 = vpop.f32.mrf.mxu3 }
0x10bc   :  { %v1604_v6 = vpop.eup %1603 }
0x10bd   :  { %731 = vrot.lane.b32.xlu1 %v1604_v6, %s1676_s0 }
0x10be   :  { %v1606_v8 = vpop.eup %1605 }
0x10bf   :  { %v712_v9 = vadd.f32 1.0, %v1606_v8  ;;  %v834_v8 = vadd.f32 %v2023_v42, %v809_v7 }
0x10c1   :  { %1607 = vrcp.f32 %v712_v9  ;;  %v724_v19 = vand.u32 2147483648, %v712_v9  ;;  %vm718_vm15 = vweird.f32 %v712_v9  ;;  %v722_v20 = vand.u32 2147483647, %v712_v9 }
0x10c3   :  { %v725_v21 = vor.u32 1.1754944e-38, %v724_v19  ;;  %vm723_vm2 = vcmp.eq.f32.partialorder %v722_v20, 8.507059e+37  ;;  %v2010_v32 = vpop.f32.mrf.mxu3 }
0x10c7   :  { %v1608_v12 = vpop.eup %1607 }
0x10c8   :  { %v714_v16 = vmul.f32 %v1608_v12, %v712_v9  ;;  %vm719_vm14 = vweird.f32 %v1608_v12 }
0x10c9   :  { %vm720_vm1 = vmor %vm718_vm15, %vm719_vm14 }
0x10ca   :  { %v715_v17 = vsub.f32 1.0, %v714_v16 }
0x10cb   :  { %v2012_v33 = vpop.f32.mrf.mxu3 }
0x10cc   :  { %v716_v18 = vmul.f32 %v1608_v12, %v715_v17 }
0x10ce   :  { %v717_v41 = vadd.f32 %v1608_v12, %v716_v18 }
0x10d0   :  { %v721_v55 = vsel %vm720_vm1, %v1608_v12, %v717_v41 }
0x10d1   :  { %v726_v10 = vsel %vm723_vm2, %v725_v21, %v721_v55 }
0x10d2   :  { %v729_v11 = vmul.f32 %v726_v10, %v671_v59 }
0x10d3   :  { %v2014_v36 = vpop.f32.mrf.mxu3 }
0x10db   :  { %v2016_v37 = vpop.f32.mrf.mxu3 }
0x10e3   :  { %v2018_v38 = vpop.f32.mrf.mxu3 }
0x10eb   :  { %v888_v39 = vpop.f32.mrf.mxu3 }
0x10ec   :  { %v898_v9 = vadd.f32 %v888_v39, %v834_v8 }
0x112f   :  { %v732_v22 = vpop.permute.xlu1 %731 }
0x1130   :  { %v734_v23 = vmul.f32 %v732_v22, %v726_v10 }
0x1132   :  { %736 = vrot.lane.b32.xlu2 %v734_v23, %s1676_s0 }
0x118c   :  { %v737_v24 = vpop.permute.xlu2 %736 }
0x118d   :  { %v739_v13 = vadd.f32 %v737_v24, %v729_v11 }
0x118f   :  { %1609 = vtanh.f32 %v739_v13 }
0x1195   :  { %v1610_v14 = vpop.eup %1609 }
0x1196   :  { %742 = vrot.lane.b32.xlu0 %v1610_v14, %s1676_s0 }
0x1208   :  { %v743_v27 = vpop.permute.xlu0 %742 }
0x1209   :  { %v745_v28 = vmul.f32 %v743_v27, %v726_v10 }
0x120b   :  { %747 = vrot.lane.b32.xlu1 %v745_v28, %s1677_s3 }
0x127d   :  { %v748_v15 = vpop.permute.xlu1 %747 }
0x127e   :  { %751 = vst.msk [vmem:[#allocation3 + $0x38] sm:$0xff] %vm51_vm0, %v748_v15 }
0x1285   :  { %v759_v30 = vld [vmem:[#allocation3 + $0x38] sm:$0xff] }
0x1286   :  { %1516 = vmatmul.msk.f32.gmra.mxu2 %vm51_vm0, %v759_v30  ;;  %1524 = vmatmul.msk.f32.gmra.mxu3 %vm51_vm0, %v759_v30 }
0x1309   :  { %v891_v45 = vpop.f32.mrf.mxu3 }
0x130a   :  { %v895_v48 = vadd.f32 %v891_v45, %v833_v44 }
0x130c   :  { %v943_v49 = vadd.f32 %v940_v46, %v895_v48  ;;  %v812_v48 = vpop.f32.mrf.mxu2 }
0x130e   :  { %1611 = vtanh.f32 %v943_v49  ;;  %v1525_v51 = vmul.f32 -1.442695, %v943_v49  ;;  %v835_v49 = vadd.f32 %v2023_v42, %v812_v48 }
0x1310   :  { %1613 = vpow2.f32 %v1525_v51 }
0x1314   :  { %v1612_v50 = vpop.eup %1611 }
0x1315   :  { %966 = vrot.lane.b32.xlu2 %v1612_v50, %s1676_s0  ;;  %v901_v50 = vadd.f32 %v2018_v38, %v835_v49 }
0x1316   :  { %v1614_v52 = vpop.eup %1613 }
0x1317   :  { %v947_v47 = vadd.f32 1.0, %v1614_v52 }
0x1319   :  { %1615 = vrcp.f32 %v947_v47  ;;  %v959_v58 = vand.u32 2147483648, %v947_v47  ;;  %vm953_vm4 = vweird.f32 %v947_v47  ;;  %v957_v59 = vand.u32 2147483647, %v947_v47 }
0x131b   :  { %v960_v61 = vor.u32 1.1754944e-38, %v959_v58  ;;  %vm958_vm6 = vcmp.eq.f32.partialorder %v957_v59, 8.507059e+37 }
0x131f   :  { %v1616_v53 = vpop.eup %1615 }
0x1320   :  { %v949_v35 = vmul.f32 %v1616_v53, %v947_v47  ;;  %vm954_vm3 = vweird.f32 %v1616_v53 }
0x1321   :  { %vm955_vm5 = vmor %vm953_vm4, %vm954_vm3 }
0x1322   :  { %v950_v54 = vsub.f32 1.0, %v949_v35 }
0x1324   :  { %v951_v56 = vmul.f32 %v1616_v53, %v950_v54 }
0x1326   :  { %v952_v57 = vadd.f32 %v1616_v53, %v951_v56 }
0x1328   :  { %v956_v60 = vsel %vm955_vm5, %v1616_v53, %v952_v57 }
0x1329   :  { %v961_v63 = vsel %vm958_vm6, %v960_v61, %v956_v60 }
0x132a   :  { %v964_v0 = vmul.f32 0.0, %v961_v63 }
0x136f   :  { %v967_v62 = vpop.permute.xlu2 %966 }
0x1370   :  { %v969_v40 = vmul.f32 %v967_v62, %v961_v63 }
0x1372   :  { %971 = vrot.lane.b32.xlu0 %v969_v40, %s1676_s0 }
0x13e4   :  { %v972_v1 = vpop.permute.xlu0 %971 }
0x13e5   :  { %v974_v2 = vadd.f32 %v972_v1, %v964_v0 }
0x13e7   :  { %1617 = vtanh.f32 %v974_v2 }
0x13ed   :  { %v1618_v3 = vpop.eup %1617 }
0x13ee   :  { %977 = vrot.lane.b32.xlu1 %v1618_v3, %s1676_s0 }
0x1460   :  { %v978_v4 = vpop.permute.xlu1 %977 }
0x1461   :  { %v2029_v5 = vmul.f32 %v978_v4, %v961_v63 }
0x1463   :  { %984 = vrot.lane.b32.xlu2 %v2029_v5, %s1677_s3 }
0x14bd   :  { %v985_v6 = vpop.permute.xlu2 %984 }
0x14be   :  { %1526 = vmatmul.msk.f32.vlgmr.msrb.gmra.mxu1 %vm51_vm0, %v985_v6 }
0x14bf   :  { %1260 = vmatpush.msrb.mxu1 %v1966_v34 }
0x14c1   :  { %1261 = vmatpush.msrb.mxu1 %v1971_v25 }
0x14c3   :  { %1262 = vmatpush.msrb.mxu1 %v1978_v26 }
0x14c5   :  { %1263 = vmatpush.msrb.mxu1 %v1988_v29 }
0x153b   :  { %v1005_v12 = vpop.f32.mrf.mxu1 }
0x153c   :  { %v1008_v16 = vadd.f32 %v1005_v12, %v898_v9 }
0x153e   :  { %1619 = vtanh.f32 %v1008_v16  ;;  %v1527_v18 = vmul.f32 -1.442695, %v1008_v16 }
0x1540   :  { %1621 = vpow2.f32 %v1527_v18 }
0x1544   :  { %v1620_v17 = vpop.eup %1619 }
0x1545   :  { %1031 = vrot.lane.b32.xlu0 %v1620_v17, %s1676_s0  ;;  %v815_v17 = vpop.f32.mrf.mxu2 }
0x1546   :  { %v1622_v41 = vpop.eup %1621  ;;  %v836_v18 = vadd.f32 %v2023_v42, %v815_v17 }
0x1547   :  { %v1012_v19 = vadd.f32 1.0, %v1622_v41 }
0x1549   :  { %1623 = vrcp.f32 %v1012_v19  ;;  %v1024_v23 = vand.u32 2147483648, %v1012_v19  ;;  %vm1018_vm8 = vweird.f32 %v1012_v19  ;;  %v1022_v11 = vand.u32 2147483647, %v1012_v19 }
0x154b   :  { %v1025_v13 = vor.u32 1.1754944e-38, %v1024_v23  ;;  %vm1023_vm10 = vcmp.eq.f32.partialorder %v1022_v11, 8.507059e+37 }
0x154d   :  { %v818_v48 = vpop.f32.mrf.mxu2 }
0x154e   :  { %v837_v49 = vadd.f32 %v2023_v42, %v818_v48 }
0x154f   :  { %v1624_v20 = vpop.eup %1623 }
0x1550   :  { %v1014_v55 = vmul.f32 %v1624_v20, %v1012_v19  ;;  %vm1019_vm7 = vweird.f32 %v1624_v20 }
0x1551   :  { %vm1020_vm9 = vmor %vm1018_vm8, %vm1019_vm7 }
0x1552   :  { %v1015_v21 = vsub.f32 1.0, %v1014_v55 }
0x1554   :  { %v1016_v22 = vmul.f32 %v1624_v20, %v1015_v21 }
0x1556   :  { %v1017_v10 = vadd.f32 %v1624_v20, %v1016_v22 }
0x1558   :  { %v1021_v24 = vsel %vm1020_vm9, %v1624_v20, %v1017_v10 }
0x1559   :  { %v1026_v27 = vsel %vm1023_vm10, %v1025_v13, %v1021_v24 }
0x155a   :  { %v1029_v15 = vmul.f32 %v1026_v27, %v974_v2 }
0x15b7   :  { %v1032_v14 = vpop.permute.xlu0 %1031 }
0x15b8   :  { %v1034_v28 = vmul.f32 %v1032_v14, %v1026_v27 }
0x15ba   :  { %1036 = vrot.lane.b32.xlu1 %v1034_v28, %s1676_s0 }
0x162c   :  { %v1037_v30 = vpop.permute.xlu1 %1036 }
0x162d   :  { %v1039_v39 = vadd.f32 %v1037_v30, %v1029_v15 }
0x162f   :  { %1625 = vtanh.f32 %v1039_v39 }
0x1635   :  { %v1626_v43 = vpop.eup %1625 }
0x1636   :  { %1042 = vrot.lane.b32.xlu2 %v1626_v43, %s1676_s0 }
0x1690   :  { %v1043_v44 = vpop.permute.xlu2 %1042 }
0x1691   :  { %v1045_v45 = vmul.f32 %v1043_v44, %v1026_v27 }
0x1693   :  { %1049 = vrot.lane.b32.xlu0 %v1045_v45, %s1677_s3  ;;  %v1046_v8 = vadd.f32 %v1045_v45, %v2029_v5  ;;  %v904_v5 = vadd.f32 %v2016_v37, %v836_v18 }
0x1705   :  { %v1050_v46 = vpop.permute.xlu0 %1049 }
0x1706   :  { %1528 = vmatmul.msk.f32.vlgmr.msra.gmra.mxu0 %vm51_vm0, %v1050_v46 }
0x1707   :  { %1325 = vmatpush.msra.mxu0 %v1966_v34 }
0x1709   :  { %1326 = vmatpush.msra.mxu0 %v1971_v25 }
0x170b   :  { %1327 = vmatpush.msra.mxu0 %v1978_v26 }
0x170d   :  { %1328 = vmatpush.msra.mxu0 %v1988_v29 }
0x1783   :  { %v1070_v51 = vpop.f32.mrf.mxu0 }
0x1784   :  { %v1073_v52 = vadd.f32 %v1070_v51, %v901_v50  ;;  %v907_v50 = vadd.f32 %v2014_v36, %v837_v49 }
0x1786   :  { %1627 = vtanh.f32 %v1073_v52  ;;  %v1529_v53 = vmul.f32 -1.442695, %v1073_v52 }
0x1788   :  { %1629 = vpow2.f32 %v1529_v53 }
0x178c   :  { %v1628_v47 = vpop.eup %1627 }
0x178d   :  { %1096 = vrot.lane.b32.xlu1 %v1628_v47, %s1676_s0 }
0x178e   :  { %v1630_v35 = vpop.eup %1629 }
0x178f   :  { %v1077_v54 = vadd.f32 1.0, %v1630_v35 }
0x1791   :  { %1631 = vrcp.f32 %v1077_v54  ;;  %v1089_v61 = vand.u32 2147483648, %v1077_v54  ;;  %vm1083_vm12 = vweird.f32 %v1077_v54  ;;  %v1087_v38 = vand.u32 2147483647, %v1077_v54 }
0x1793   :  { %v1090_v63 = vor.u32 1.1754944e-38, %v1089_v61  ;;  %vm1088_vm14 = vcmp.eq.f32.partialorder %v1087_v38, 8.507059e+37 }
0x1797   :  { %v1632_v56 = vpop.eup %1631 }
0x1798   :  { %v1079_v57 = vmul.f32 %v1632_v56, %v1077_v54  ;;  %vm1084_vm11 = vweird.f32 %v1632_v56 }
0x1799   :  { %vm1085_vm13 = vmor %vm1083_vm12, %vm1084_vm11 }
0x179a   :  { %v1080_v58 = vsub.f32 1.0, %v1079_v57 }
0x179c   :  { %v1081_v59 = vmul.f32 %v1632_v56, %v1080_v58 }
0x179e   :  { %v1082_v60 = vadd.f32 %v1632_v56, %v1081_v59 }
0x17a0   :  { %v1086_v62 = vsel %vm1085_vm13, %v1632_v56, %v1082_v60 }
0x17a1   :  { %v1091_v0 = vsel %vm1088_vm14, %v1090_v63, %v1086_v62 }
0x17a2   :  { %v1094_v2 = vmul.f32 %v1091_v0, %v1039_v39 }
0x17ff   :  { %v1097_v40 = vpop.permute.xlu1 %1096 }
0x1800   :  { %v1099_v1 = vmul.f32 %v1097_v40, %v1091_v0 }
0x1802   :  { %1101 = vrot.lane.b32.xlu2 %v1099_v1, %s1676_s0 }
0x185c   :  { %v1102_v3 = vpop.permute.xlu2 %1101 }
0x185d   :  { %v1104_v4 = vadd.f32 %v1102_v3, %v1094_v2 }
0x185f   :  { %1633 = vtanh.f32 %v1104_v4 }
0x1865   :  { %v1634_v6 = vpop.eup %1633 }
0x1866   :  { %1107 = vrot.lane.b32.xlu0 %v1634_v6, %s1676_s0 }
0x18d8   :  { %v1108_v7 = vpop.permute.xlu0 %1107 }
0x18d9   :  { %v1110_v9 = vmul.f32 %v1108_v7, %v1091_v0 }
0x18db   :  { %v1111_v12 = vadd.f32 %v1110_v9, %v1046_v8  ;;  %1114 = vrot.lane.b32.xlu1 %v1110_v9, %s1677_s3 }
0x194d   :  { %v1115_v16 = vpop.permute.xlu1 %1114 }
0x194e   :  { %1530 = vmatmul.msk.f32.vlgmr.msra.gmra.mxu1 %vm51_vm0, %v1115_v16 }
0x194f   :  { %1390 = vmatpush.msra.mxu1 %v1966_v34 }
0x1951   :  { %1391 = vmatpush.msra.mxu1 %v1971_v25 }
0x1953   :  { %1392 = vmatpush.msra.mxu1 %v1978_v26 }
0x1955   :  { %1393 = vmatpush.msra.mxu1 %v1988_v29 }
0x19cb   :  { %v1135_v41 = vpop.f32.mrf.mxu1 }
0x19cc   :  { %v1138_v19 = vadd.f32 %v1135_v41, %v904_v5 }
0x19ce   :  { %1635 = vtanh.f32 %v1138_v19  ;;  %v1531_v55 = vmul.f32 -1.442695, %v1138_v19 }
0x19d0   :  { %1637 = vpow2.f32 %v1531_v55 }
0x19d4   :  { %v1636_v20 = vpop.eup %1635 }
0x19d5   :  { %1161 = vrot.lane.b32.xlu2 %v1636_v20, %s1676_s0 }
0x19d6   :  { %v1638_v34 = vpop.eup %1637 }
0x19d7   :  { %v1142_v21 = vadd.f32 1.0, %v1638_v34 }
0x19d9   :  { %1639 = vrcp.f32 %v1142_v21  ;;  %v1154_v23 = vand.u32 2147483648, %v1142_v21  ;;  %vm1148_vm1 = vweird.f32 %v1142_v21  ;;  %v1152_v37 = vand.u32 2147483647, %v1142_v21 }
0x19db   :  { %v1155_v24 = vor.u32 1.1754944e-38, %v1154_v23  ;;  %vm1153_vm3 = vcmp.eq.f32.partialorder %v1152_v37, 8.507059e+37 }
0x19df   :  { %v1640_v25 = vpop.eup %1639 }
0x19e0   :  { %v1144_v26 = vmul.f32 %v1640_v25, %v1142_v21  ;;  %vm1149_vm15 = vweird.f32 %v1640_v25 }
0x19e1   :  { %vm1150_vm2 = vmor %vm1148_vm1, %vm1149_vm15 }
0x19e2   :  { %v1145_v22 = vsub.f32 1.0, %v1144_v26 }
0x19e4   :  { %v1146_v29 = vmul.f32 %v1640_v25, %v1145_v22 }
0x19e6   :  { %v1147_v10 = vadd.f32 %v1640_v25, %v1146_v29 }
0x19e8   :  { %v1151_v11 = vsel %vm1150_vm2, %v1640_v25, %v1147_v10 }
0x19e9   :  { %v1156_v14 = vsel %vm1153_vm3, %v1155_v24, %v1151_v11 }
0x19ea   :  { %v1159_v28 = vmul.f32 %v1156_v14, %v1104_v4 }
0x1a2f   :  { %v1162_v13 = vpop.permute.xlu2 %1161 }
0x1a30   :  { %v1164_v27 = vmul.f32 %v1162_v13, %v1156_v14 }
0x1a32   :  { %1166 = vrot.lane.b32.xlu0 %v1164_v27, %s1676_s0 }
0x1aa4   :  { %v1167_v15 = vpop.permute.xlu0 %1166 }
0x1aa5   :  { %v1169_v30 = vadd.f32 %v1167_v15, %v1159_v28 }
0x1aa7   :  { %1641 = vtanh.f32 %v1169_v30 }
0x1aad   :  { %v1642_v39 = vpop.eup %1641 }
0x1aae   :  { %1172 = vrot.lane.b32.xlu1 %v1642_v39, %s1676_s0 }
0x1b20   :  { %v1173_v43 = vpop.permute.xlu1 %1172 }
0x1b21   :  { %v1175_v44 = vmul.f32 %v1173_v43, %v1156_v14 }
0x1b23   :  { %v1176_v45 = vadd.f32 %v1175_v44, %v1111_v12  ;;  %1179 = vrot.lane.b32.xlu2 %v1175_v44, %s1677_s3  ;;  %v821_v12 = vpop.f32.mrf.mxu2 }
0x1b24   :  { %v838_v16 = vadd.f32 %v2023_v42, %v821_v12 }
0x1b26   :  { %v910_v17 = vadd.f32 %v2012_v33, %v838_v16 }
0x1b2b   :  { %v824_v44 = vpop.f32.mrf.mxu2 }
0x1b7d   :  { %v1180_v46 = vpop.permute.xlu2 %1179 }
0x1b7e   :  { %1532 = vmatmul.msk.f32.vlgmr.msrb.gmra.mxu0 %vm51_vm0, %v1180_v46 }
0x1bfb   :  { %v1200_v51 = vpop.f32.mrf.mxu0 }
0x1bfc   :  { %v1203_v52 = vadd.f32 %v1200_v51, %v907_v50 }
0x1bfe   :  { %1643 = vtanh.f32 %v1203_v52  ;;  %v1533_v53 = vmul.f32 -1.442695, %v1203_v52 }
0x1c00   :  { %1645 = vpow2.f32 %v1533_v53 }
0x1c04   :  { %v1644_v47 = vpop.eup %1643 }
0x1c05   :  { %1226 = vrot.lane.b32.xlu0 %v1644_v47, %s1676_s0 }
0x1c06   :  { %v1646_v35 = vpop.eup %1645 }
0x1c07   :  { %v1207_v54 = vadd.f32 1.0, %v1646_v35 }
0x1c09   :  { %1647 = vrcp.f32 %v1207_v54  ;;  %v1219_v61 = vand.u32 2147483648, %v1207_v54  ;;  %vm1213_vm5 = vweird.f32 %v1207_v54  ;;  %v1217_v36 = vand.u32 2147483647, %v1207_v54 }
0x1c0b   :  { %v1220_v62 = vor.u32 1.1754944e-38, %v1219_v61  ;;  %vm1218_vm7 = vcmp.eq.f32.partialorder %v1217_v36, 8.507059e+37 }
0x1c0f   :  { %v1648_v56 = vpop.eup %1647 }
0x1c10   :  { %v1209_v57 = vmul.f32 %v1648_v56, %v1207_v54  ;;  %vm1214_vm4 = vweird.f32 %v1648_v56 }
0x1c11   :  { %vm1215_vm6 = vmor %vm1213_vm5, %vm1214_vm4  ;;  %vm1472_vm5 = vcmask 31744  }
0x1c12   :  { %v1210_v58 = vsub.f32 1.0, %v1209_v57 }
0x1c14   :  { %v1211_v59 = vmul.f32 %v1648_v56, %v1210_v58 }
0x1c16   :  { %v1212_v60 = vadd.f32 %v1648_v56, %v1211_v59 }
0x1c18   :  { %v1216_v38 = vsel %vm1215_vm6, %v1648_v56, %v1212_v60 }
0x1c19   :  { %v1221_v40 = vsel %vm1218_vm7, %v1220_v62, %v1216_v38 }
0x1c1a   :  { %v1224_v1 = vmul.f32 %v1221_v40, %v1169_v30 }
0x1c77   :  { %v1227_v63 = vpop.permute.xlu0 %1226 }
0x1c78   :  { %v1229_v0 = vmul.f32 %v1227_v63, %v1221_v40 }
0x1c7a   :  { %1231 = vrot.lane.b32.xlu1 %v1229_v0, %s1676_s0 }
0x1cec   :  { %v1232_v2 = vpop.permute.xlu1 %1231 }
0x1ced   :  { %v1234_v3 = vadd.f32 %v1232_v2, %v1224_v1 }
0x1cef   :  { %1649 = vtanh.f32 %v1234_v3 }
0x1cf5   :  { %v1650_v4 = vpop.eup %1649 }
0x1cf6   :  { %1237 = vrot.lane.b32.xlu2 %v1650_v4, %s1676_s0 }
0x1d50   :  { %v1238_v6 = vpop.permute.xlu2 %1237 }
0x1d51   :  { %v1240_v7 = vmul.f32 %v1238_v6, %v1221_v40  ;;  %v827_v6 = vpop.f32.mrf.mxu2 }
0x1d53   :  { %v1241_v8 = vadd.f32 %v1240_v7, %v1176_v45  ;;  %1244 = vrot.lane.b32.xlu0 %v1240_v7, %s1677_s3  ;;  %v839_v45 = vadd.f32 %v2023_v42, %v824_v44  ;;  %v840_v7 = vadd.f32 %v2023_v42, %v827_v6 }
0x1d55   :  { %v913_v46 = vadd.f32 %v2010_v32, %v839_v45 }
0x1dc5   :  { %v1245_v9 = vpop.permute.xlu0 %1244 }
0x1dc6   :  { %1534 = vmatmul.msk.f32.vlgmr.msrb.gmra.mxu1 %vm51_vm0, %v1245_v9 }
0x1e43   :  { %v1265_v18 = vpop.f32.mrf.mxu1 }
0x1e44   :  { %v1268_v5 = vadd.f32 %v1265_v18, %v910_v17 }
0x1e46   :  { %1651 = vtanh.f32 %v1268_v5  ;;  %v1535_v19 = vmul.f32 -1.442695, %v1268_v5 }
0x1e48   :  { %1653 = vpow2.f32 %v1535_v19 }
0x1e4c   :  { %v1652_v41 = vpop.eup %1651 }
0x1e4d   :  { %1291 = vrot.lane.b32.xlu1 %v1652_v41, %s1676_s0 }
0x1e4e   :  { %v1654_v20 = vpop.eup %1653 }
0x1e4f   :  { %v1272_v55 = vadd.f32 1.0, %v1654_v20 }
0x1e51   :  { %1655 = vrcp.f32 %v1272_v55  ;;  %v1284_v29 = vand.u32 2147483648, %v1272_v55  ;;  %vm1278_vm9 = vweird.f32 %v1272_v55  ;;  %v1282_v33 = vand.u32 2147483647, %v1272_v55 }
0x1e53   :  { %v1285_v23 = vor.u32 1.1754944e-38, %v1284_v29  ;;  %vm1283_vm11 = vcmp.eq.f32.partialorder %v1282_v33, 8.507059e+37 }
0x1e57   :  { %v1656_v34 = vpop.eup %1655 }
0x1e58   :  { %v1274_v21 = vmul.f32 %v1656_v34, %v1272_v55  ;;  %vm1279_vm8 = vweird.f32 %v1656_v34 }
0x1e59   :  { %vm1280_vm10 = vmor %vm1278_vm9, %vm1279_vm8 }
0x1e5a   :  { %v1275_v25 = vsub.f32 1.0, %v1274_v21 }
0x1e5c   :  { %v1276_v26 = vmul.f32 %v1656_v34, %v1275_v25 }
0x1e5e   :  { %v1277_v22 = vadd.f32 %v1656_v34, %v1276_v26 }
0x1e60   :  { %v1281_v10 = vsel %vm1280_vm10, %v1656_v34, %v1277_v22 }
0x1e61   :  { %v1286_v11 = vsel %vm1283_vm11, %v1285_v23, %v1281_v10 }
0x1e62   :  { %v1289_v13 = vmul.f32 %v1286_v11, %v1234_v3 }
0x1ebf   :  { %v1292_v37 = vpop.permute.xlu1 %1291 }
0x1ec0   :  { %v1294_v24 = vmul.f32 %v1292_v37, %v1286_v11 }
0x1ec2   :  { %1296 = vrot.lane.b32.xlu2 %v1294_v24, %s1676_s0  ;;  %v1439_v24 = vld [vmem:[%s2122_s9 + $0x10] sm:$0xff] }
0x1f1c   :  { %v1297_v14 = vpop.permute.xlu2 %1296 }
0x1f1d   :  { %v1299_v27 = vadd.f32 %v1297_v14, %v1289_v13  ;;  %v1438_v13 = vld [vmem:[%s2122_s9 + $0x8] sm:$0xff]  ;;  %v1437_v14 = vld [vmem:[%s2122_s9] sm:$0xff] }
0x1f1f   :  { %1657 = vtanh.f32 %v1299_v27 }
0x1f25   :  { %v1658_v28 = vpop.eup %1657 }
0x1f26   :  { %1302 = vrot.lane.b32.xlu0 %v1658_v28, %s1676_s0 }
0x1f98   :  { %v1303_v15 = vpop.permute.xlu0 %1302 }
0x1f99   :  { %v1305_v30 = vmul.f32 %v1303_v15, %v1286_v11  ;;  %v1440_v11 = vld [vmem:[%s2122_s9 + $0x18] sm:$0xff] }
0x1f9a   :  { %1458 = vmatpush.msrb.mxu0 %v1440_v11 }
0x1f9b   :  { %v1306_v39 = vadd.f32 %v1305_v30, %v1241_v8  ;;  %1309 = vrot.lane.b32.xlu1 %v1305_v30, %s1677_s3  ;;  %v916_v8 = vadd.f32 %v2008_v31, %v840_v7 }
0x1f9c   :  { %1459 = vmatpush.msrb.mxu0 %v1439_v24 }
0x1f9e   :  { %1460 = vmatpush.msrb.mxu0 %v1438_v13 }
0x1fa0   :  { %1461 = vmatpush.msrb.mxu0 %v1437_v14 }
0x200d   :  { %v1310_v43 = vpop.permute.xlu1 %1309 }
0x200e   :  { %1536 = vmatmul.msk.f32.vlgmr.msra.gmra.mxu0 %vm51_vm0, %v1310_v43 }
0x208b   :  { %v1330_v48 = vpop.f32.mrf.mxu0 }
0x208c   :  { %v1333_v49 = vadd.f32 %v1330_v48, %v913_v46 }
0x208e   :  { %1659 = vtanh.f32 %v1333_v49  ;;  %v1537_v51 = vmul.f32 -1.442695, %v1333_v49 }
0x2090   :  { %1661 = vpow2.f32 %v1537_v51 }
0x2094   :  { %v1660_v50 = vpop.eup %1659 }
0x2095   :  { %1356 = vrot.lane.b32.xlu2 %v1660_v50, %s1676_s0 }
0x2096   :  { %v1662_v52 = vpop.eup %1661 }
0x2097   :  { %v1337_v47 = vadd.f32 1.0, %v1662_v52 }
0x2099   :  { %1663 = vrcp.f32 %v1337_v47  ;;  %v1349_v58 = vand.u32 2147483648, %v1337_v47  ;;  %vm1343_vm13 = vweird.f32 %v1337_v47  ;;  %v1347_v32 = vand.u32 2147483647, %v1337_v47 }
0x209b   :  { %v1350_v60 = vor.u32 1.1754944e-38, %v1349_v58  ;;  %vm1348_vm15 = vcmp.eq.f32.partialorder %v1347_v32, 8.507059e+37 }
0x209f   :  { %v1664_v53 = vpop.eup %1663 }
0x20a0   :  { %v1339_v35 = vmul.f32 %v1664_v53, %v1337_v47  ;;  %vm1344_vm12 = vweird.f32 %v1664_v53 }
0x20a1   :  { %vm1345_vm14 = vmor %vm1343_vm13, %vm1344_vm12 }
0x20a2   :  { %v1340_v54 = vsub.f32 1.0, %v1339_v35 }
0x20a4   :  { %v1341_v56 = vmul.f32 %v1664_v53, %v1340_v54 }
0x20a6   :  { %v1342_v57 = vadd.f32 %v1664_v53, %v1341_v56 }
0x20a8   :  { %v1346_v59 = vsel %vm1345_vm14, %v1664_v53, %v1342_v57 }
0x20a9   :  { %v1351_v36 = vsel %vm1348_vm15, %v1350_v60, %v1346_v59 }
0x20aa   :  { %v1354_v62 = vmul.f32 %v1351_v36, %v1299_v27 }
0x20ef   :  { %v1357_v61 = vpop.permute.xlu2 %1356 }
0x20f0   :  { %v1359_v38 = vmul.f32 %v1357_v61, %v1351_v36 }
0x20f2   :  { %1361 = vrot.lane.b32.xlu0 %v1359_v38, %s1676_s0 }
0x2164   :  { %v1362_v63 = vpop.permute.xlu0 %1361 }
0x2165   :  { %v1364_v40 = vadd.f32 %v1362_v63, %v1354_v62 }
0x2167   :  { %1665 = vtanh.f32 %v1364_v40 }
0x216d   :  { %v1666_v0 = vpop.eup %1665 }
0x216e   :  { %1367 = vrot.lane.b32.xlu1 %v1666_v0, %s1676_s0 }
0x21e0   :  { %v1368_v1 = vpop.permute.xlu1 %1367 }
0x21e1   :  { %v1370_v2 = vmul.f32 %v1368_v1, %v1351_v36 }
0x21e3   :  { %v1371_v3 = vadd.f32 %v1370_v2, %v1306_v39  ;;  %1374 = vrot.lane.b32.xlu2 %v1370_v2, %s1677_s3  ;;  %v1546_v39 = vld [vmem:[%s2123_s10] ss:$0 sm:$0xff] }
0x223d   :  { %v1375_v4 = vpop.permute.xlu2 %1374 }
0x223e   :  { %1538 = vmatmul.msk.f32.vlgmr.msra.gmra.mxu1 %vm51_vm0, %v1375_v4 }
0x22bb   :  { %v1395_v9 = vpop.f32.mrf.mxu1 }
0x22bc   :  { %v1398_v12 = vadd.f32 %v1395_v9, %v916_v8 }
0x22be   :  { %1667 = vtanh.f32 %v1398_v12  ;;  %v1539_v17 = vmul.f32 -1.442695, %v1398_v12 }
0x22c0   :  { %1669 = vpow2.f32 %v1539_v17 }
0x22c4   :  { %v1668_v16 = vpop.eup %1667 }
0x22c5   :  { %1421 = vrot.lane.b32.xlu0 %v1668_v16, %s1676_s0 }
0x22c6   :  { %v1670_v18 = vpop.eup %1669 }
0x22c7   :  { %v1402_v5 = vadd.f32 1.0, %v1670_v18 }
0x22c9   :  { %1671 = vrcp.f32 %v1402_v5  ;;  %v1414_v42 = vand.u32 2147483648, %v1402_v5  ;;  %vm1408_vm2 = vweird.f32 %v1402_v5  ;;  %v1412_v31 = vand.u32 2147483647, %v1402_v5 }
0x22cb   :  { %v1415_v25 = vor.u32 1.1754944e-38, %v1414_v42  ;;  %vm1413_vm4 = vcmp.eq.f32.partialorder %v1412_v31, 8.507059e+37 }
0x22cf   :  { %v1672_v41 = vpop.eup %1671 }
0x22d0   :  { %v1404_v19 = vmul.f32 %v1672_v41, %v1402_v5  ;;  %vm1409_vm1 = vweird.f32 %v1672_v41 }
0x22d1   :  { %vm1410_vm3 = vmor %vm1408_vm2, %vm1409_vm1 }
0x22d2   :  { %v1405_v20 = vsub.f32 1.0, %v1404_v19 }
0x22d4   :  { %v1406_v55 = vmul.f32 %v1672_v41, %v1405_v20 }
0x22d6   :  { %v1407_v34 = vadd.f32 %v1672_v41, %v1406_v55 }
0x22d8   :  { %v1411_v21 = vsel %vm1410_vm3, %v1672_v41, %v1407_v34 }
0x22d9   :  { %v1416_v22 = vsel %vm1413_vm4, %v1415_v25, %v1411_v21 }
0x22da   :  { %v1419_v33 = vmul.f32 %v1416_v22, %v1364_v40 }
0x2337   :  { %v1422_v26 = vpop.permute.xlu0 %1421 }
0x2338   :  { %v1424_v29 = vmul.f32 %v1422_v26, %v1416_v22 }
0x233a   :  { %1426 = vrot.lane.b32.xlu1 %v1424_v29, %s1676_s0 }
0x23ac   :  { %v1427_v10 = vpop.permute.xlu1 %1426 }
0x23ad   :  { %v1429_v23 = vadd.f32 %v1427_v10, %v1419_v33 }
0x23af   :  { %1673 = vtanh.f32 %v1429_v23 }
0x23b5   :  { %v1674_v37 = vpop.eup %1673 }
0x23b6   :  { %1432 = vrot.lane.b32.xlu2 %v1674_v37, %s1676_s0 }
0x2410   :  { %v1433_v27 = vpop.permute.xlu2 %1432 }
0x2411   :  { %v1435_v28 = vmul.f32 %v1433_v27, %v1416_v22 }
0x2413   :  { %v1436_v15 = vadd.f32 %v1435_v28, %v1371_v3 }
0x2415   :  { %1442 = vrot.lane.b32.xlu0 %v1436_v15, %s1677_s3 }
0x2487   :  { %v1443_v30 = vpop.permute.xlu0 %1442 }
0x2488   :  { %1540 = vmatmul.msk.f32.vlgmr.msrb.gmra.mxu0 %vm51_vm0, %v1443_v30 }
0x2505   :  { %v1463_v43 = vpop.f32.mrf.mxu0 }
0x2506   :  { %v1466_v44 = vmul.f32 0.125, %v1463_v43 }
0x2508   :  { %v1471_v45 = vadd.f32 %v1546_v39, %v1466_v44 }
0x250a   :  { %1473 = vst.msk [vmem:[%s2124_s11] sm:$0xff] %vm1472_vm5, %v1471_v45 }

</bundles_post_ra>
